<compile_context>
chip_gen: v5e
topology: v5e:2x2
jax: 0.10.0
libtpu: 0.0.40
codegen_flags: <defaults>
</compile_context>

<pallas_src>
import numpy as np
import jax
import jax.numpy as jnp
from jax.experimental import pallas as pl
from jax.experimental.pallas import tpu as pltpu


# ============================================================================
# Kernel 1: batched dynamic mask head (rel coords + 3 grouped 1x1 convs)
#   grid = (Npad // TN,), one block of TN instances per step.
#   Spatial axis is flattened to HW (multiple of 128) on the lane dimension, so
#   each grouped 1x1 conv is a tiny per-instance matmul.
# ============================================================================
def _make_head_kernel(tn):
    def kernel(scal_ref, grid_ref, feat_ref, w0_ref, b0_ref, w1_ref, b1_ref,
               w2_ref, b2_ref, out_ref):
        g = grid_ref[...]                                    # (2, HW): row0=y, row1=x
        scal = scal_ref[...]                                 # (TN, 4) = [y, x, 1/soi, 0]
        # relative coords for the whole instance block at once (VPU, 2-D only)
        rel_y = (scal[:, 0:1] - g[0:1, :]) * scal[:, 2:3]    # (TN, HW)
        rel_x = (scal[:, 1:2] - g[1:2, :]) * scal[:, 2:3]    # (TN, HW)
        for i in range(tn):                                  # unrolled tiny loop
            feat = feat_ref[i]                               # (C, HW)
            w0 = w0_ref[i]                                   # (Cout, C+2)
            # layer 0 over channels [rel_y, rel_x, feat] (split to avoid concat)
            h = jnp.dot(w0[:, 2:], feat, preferred_element_type=jnp.float32)
            h = (h + w0[:, 0:1] * rel_y[i:i + 1, :]
                   + w0[:, 1:2] * rel_x[i:i + 1, :]
                   + b0_ref[i])
            h = h * pl.reciprocal(1.0 + jnp.exp(-h), approx=True)   # SiLU (EUP)
            # layer 1
            h = jnp.dot(w1_ref[i], h, preferred_element_type=jnp.float32) + b1_ref[i]
            h = h * pl.reciprocal(1.0 + jnp.exp(-h), approx=True)   # SiLU (EUP)
            # layer 2 (to 1 channel, no activation)
            o = jnp.dot(w2_ref[i], h, preferred_element_type=jnp.float32) + b2_ref[i]
            out_ref[i:i + 1, :] = o                          # (1, HW)
    return kernel


# ============================================================================
# Kernel 2: aligned_bilinear -> sigmoid -> bilinear(align_corners=True, x4)
#   grid = (Npad // TN,), block of TN instances per step.
#   Separable interpolation matmuls; the W-direction matmuls are folded across
#   the instance block (instances stacked into the matmul M dimension).
# ============================================================================
def _make_upsample_kernel(tn, H, W, fH, fW, OH, OW):
    def kernel(x_ref, mh_ref, mwt_ref, bh_ref, bwt_ref, out_ref, stage_ref):
        x = x_ref[...]                                       # (TN, H, W)
        # first-stage W direction, folded over instances: (TN*H, W) @ (W, fW)
        xw = jnp.dot(x.reshape(tn * H, W), mwt_ref[...],
                     preferred_element_type=jnp.float32)     # (TN*H, fW)
        for i in range(tn):                                  # unrolled tiny loop
            t = jnp.dot(mh_ref[...], xw[i * H:(i + 1) * H, :],
                        preferred_element_type=jnp.float32)  # (fH, fW)
            s = 1.0 / (1.0 + jnp.exp(-t))                    # sigmoid (exact)
            stage_ref[i] = jnp.dot(bh_ref[...], s,
                                   preferred_element_type=jnp.float32)  # (OH, fW)
        # dominant matmul: W direction of the x4 upsample, folded over instances
        hs = stage_ref[...]                                  # (TN, OH, fW)
        out = jnp.dot(hs.reshape(tn * OH, fW), bwt_ref[...],
                      preferred_element_type=jnp.float32)    # (TN*OH, OW)
        out_ref[...] = out.reshape(tn, OH, OW)
    return kernel


# ---------------------------------------------------------------------------
# Interpolation-matrix helpers (host-side numpy glue)
# ---------------------------------------------------------------------------
def _interp_matrix_align_corners(out_size, in_size):
    A = np.zeros((out_size, in_size), dtype=np.float32)
    if in_size == 1:
        A[:, 0] = 1.0
        return A
    for o in range(out_size):
        src = 0.0 if out_size == 1 else o * (in_size - 1) / (out_size - 1)
        i0 = min(int(np.floor(src)), in_size - 1)
        i1 = min(i0 + 1, in_size - 1)
        w = src - i0
        A[o, i0] += (1.0 - w)
        A[o, i1] += w
    return A


def _aligned_bilinear_matrix(size, factor):
    # matrix M such that aligned_bilinear(x)[axis] = M @ x[axis]
    if factor == 1:
        return np.eye(size, dtype=np.float32)
    pad_end = np.zeros((size + 1, size), dtype=np.float32)
    pad_end[:size] = np.eye(size, dtype=np.float32)
    pad_end[size, size - 1] = 1.0                                   # replicate pad (end)
    A = _interp_matrix_align_corners(factor * size + 1, size + 1)   # align_corners=True
    pad_front = np.zeros((factor * size + 1 + factor // 2, factor * size + 1),
                         dtype=np.float32)
    pad_front[:factor // 2, 0] = 1.0                                # replicate pad (front)
    pad_front[factor // 2:] = np.eye(factor * size + 1, dtype=np.float32)
    M = pad_front @ A @ pad_end
    return M[:factor * size]                                        # crop


# ---------------------------------------------------------------------------
# Wrapper: DynamicMaskHead.forward (eval / inference path)
# ---------------------------------------------------------------------------
def dynamic_mask_head_forward(mask_feats, mask_feat_stride, extra_infos,
                              in_channel=8, out_channel=8, mask_stride_out=4,
                              soi=(64, 128, 256), instances_per_block=8):
    B, C, H, W = mask_feats.shape
    assert C == in_channel
    assert in_channel == out_channel, "bias parsing assumes in_channel == out_channel"
    HW = H * W
    Cout = out_channel
    TN = instances_per_block
    N = int(extra_infos['num_fg'])

    # pad instance count up to a multiple of the per-step block size
    n_blocks = max(1, -(-N // TN))
    Npad = n_blocks * TN
    pad = Npad - N

    def _pad_rows(a):
        return jnp.pad(a, ((0, pad),) + ((0, 0),) * (a.ndim - 1))

    img_inds = jnp.asarray(extra_infos['img_inds'], jnp.int32)
    params = extra_infos['pos_ctl_preds'].astype(jnp.float32)         # (N, 169)
    pos_loc = extra_infos['pos_grid_positions'].astype(jnp.float32)   # (N, 2) = (y, x)
    fpn_lvl = extra_infos['pos_fpn_levels']
    soi_per_inst = jnp.asarray(soi, jnp.float32)[fpn_lvl]             # (N,)
    inv_soi = 1.0 / soi_per_inst

    img_inds_p = jnp.pad(img_inds, (0, pad))                          # pad -> image 0 (sliced off later)
    params_p = _pad_rows(params)
    # per-instance scalar block [pos_y, pos_x, 1/soi, 0]; zero padding is safe
    scal = jnp.stack([pos_loc[:, 0], pos_loc[:, 1], inv_soi,
                      jnp.zeros_like(inv_soi)], axis=1)               # (N, 4)
    scal_p = _pad_rows(scal)                                          # (Npad, 4)

    # ---- coordinate grid (same as torch: stack((yv, xv)) * s + 0.5*s), stored (2, HW)
    yv, xv = jnp.meshgrid(jnp.arange(H), jnp.arange(W), indexing='ij')
    grid_coords = jnp.stack([yv.reshape(-1), xv.reshape(-1)], axis=0).astype(jnp.float32)
    grid_coords = grid_coords * mask_feat_stride + 0.5 * mask_feat_stride   # (2, HW)

    # ---- gather per-instance features (glue) -> (Npad, C, HW)
    # TODO(synk): for N >> B this duplicate copy could be avoided with scalar-
    #             prefetched img_inds + in-kernel dynamic indexing; it is ~1/8
    #             of the output bytes so kept simple here.
    feats_g = jnp.take(mask_feats.astype(jnp.float32).reshape(B, C, HW),
                       img_inds_p, axis=0)                            # (Npad, C, HW)

    # ---- parse dynamic params: sizes [80, 64, 8, 8, 8, 1]
    wn0, wn1, wn2 = (C + 2) * Cout, Cout * C, C * 1
    bn0, bn1, bn2 = C, C, 1          # torch uses in_channel for both hidden biases
    o1 = wn0
    o2 = o1 + wn1
    o3 = o2 + wn2
    o4 = o3 + bn0
    o5 = o4 + bn1
    o6 = o5 + bn2
    w0 = params_p[:, 0:o1].reshape(Npad, Cout, C + 2)
    w1 = params_p[:, o1:o2].reshape(Npad, Cout, C)
    w2 = params_p[:, o2:o3].reshape(Npad, 1, C)
    b0 = params_p[:, o3:o4].reshape(Npad, Cout, 1)
    b1 = params_p[:, o4:o5].reshape(Npad, Cout, 1)   # Cout (== in_channel) per layer-1 output
    b2 = params_p[:, o5:o6].reshape(Npad, 1, 1)

    parallel = pltpu.CompilerParams(dimension_semantics=("parallel",))

    # ---- kernel 1: batched dynamic conv head -> (Npad, HW) lane-dense logits
    logits_flat = pl.pallas_call(
        _make_head_kernel(TN),
        out_shape=jax.ShapeDtypeStruct((Npad, HW), jnp.float32),
        grid_spec=pltpu.PrefetchScalarGridSpec(
            num_scalar_prefetch=0,
            grid=(n_blocks,),
            in_specs=[
                pl.BlockSpec((TN, 4), lambda b: (b, 0)),                   # scal
                pl.BlockSpec((2, HW), lambda b: (0, 0)),                   # grid coords
                pl.BlockSpec((TN, C, HW), lambda b: (b, 0, 0)),            # feats
                pl.BlockSpec((TN, Cout, C + 2), lambda b: (b, 0, 0)),      # w0
                pl.BlockSpec((TN, Cout, 1), lambda b: (b, 0, 0)),          # b0
                pl.BlockSpec((TN, Cout, C), lambda b: (b, 0, 0)),          # w1
                pl.BlockSpec((TN, Cout, 1), lambda b: (b, 0, 0)),          # b1
                pl.BlockSpec((TN, 1, C), lambda b: (b, 0, 0)),             # w2
                pl.BlockSpec((TN, 1, 1), lambda b: (b, 0, 0)),             # b2
            ],
            out_specs=pl.BlockSpec((TN, HW), lambda b: (b, 0)),
        ),
        compiler_params=parallel,
    )(scal_p, grid_coords, feats_g, w0, b0, w1, b1, w2, b2)

    # free layout change (row-major view) at the XLA level: (Npad, HW) -> (Npad, H, W)
    mask_logits = logits_flat.reshape(Npad, H, W)

    # ---- interpolation matrices: aligned_bilinear(factor) then x4 align_corners=True
    assert mask_feat_stride % mask_stride_out == 0
    factor = mask_feat_stride // mask_stride_out
    fH, fW = factor * H, factor * W
    OH, OW = mask_stride_out * fH, mask_stride_out * fW
    Mh = jnp.asarray(_aligned_bilinear_matrix(H, factor))             # (fH, H)
    MwT = jnp.asarray(_aligned_bilinear_matrix(W, factor)).T          # (W, fW)
    Bh = jnp.asarray(_interp_matrix_align_corners(OH, fH))            # (OH, fH)
    BwT = jnp.asarray(_interp_matrix_align_corners(OW, fW)).T         # (fW, OW)

    # ---- kernel 2: aligned_bilinear + sigmoid + x4 bilinear upsample -> (Npad, OH, OW)
    mask_scores_p = pl.pallas_call(
        _make_upsample_kernel(TN, H, W, fH, fW, OH, OW),
        out_shape=jax.ShapeDtypeStruct((Npad, OH, OW), jnp.float32),
        grid_spec=pltpu.PrefetchScalarGridSpec(
            num_scalar_prefetch=0,
            grid=(n_blocks,),
            in_specs=[
                pl.BlockSpec((TN, H, W), lambda b: (b, 0, 0)),
                pl.BlockSpec((fH, H), lambda b: (0, 0)),
                pl.BlockSpec((W, fW), lambda b: (0, 0)),
                pl.BlockSpec((OH, fH), lambda b: (0, 0)),
                pl.BlockSpec((fW, OW), lambda b: (0, 0)),
            ],
            out_specs=pl.BlockSpec((TN, OH, OW), lambda b: (b, 0, 0)),
            scratch_shapes=[pltpu.VMEM((TN, OH, fW), jnp.float32)],
        ),
        compiler_params=parallel,
    )(mask_logits, Mh, MwT, Bh, BwT)

    mask_scores = mask_scores_p[:N]                                   # drop padding

    # ---- group results per image. Only the *input* img_inds is copied to host
    #      (does not block on the Pallas results); per-image gathers stay lazy.
    img_np = np.asarray(img_inds)
    bbox_preds = extra_infos['pos_bbox_preds']
    bbox_out, mask_out = [], []
    for img_id in np.unique(img_np).tolist():
        idx = jnp.asarray(np.nonzero(img_np == img_id)[0], jnp.int32)
        mask_out.append(jnp.take(mask_scores, idx, axis=0))
        bbox_out.append(jnp.take(bbox_preds, idx, axis=0))
    return bbox_out, mask_out


# ---------------------------------------------------------------------------
if __name__ == "__main__":
    key = jax.random.PRNGKey(0)
    k1, k2, k3, k4 = jax.random.split(key, 4)

    B, C, H, W = 2, 8, 16, 16
    N = 4                       # num_fg instances
    NUM_GEN_PARAMS = (C + 2) * 8 + 8 * C + C + 8 + 8 + 1   # = 169
    mask_feat_stride = 8

    mask_feats = jax.random.normal(k1, (B, C, H, W), dtype=jnp.float32)
    pos_ctl_preds = jax.random.normal(k2, (N, NUM_GEN_PARAMS), dtype=jnp.float32) * 0.1
    pos_grid_positions = jax.random.uniform(
        k3, (N, 2), dtype=jnp.float32, minval=0.0, maxval=float(H * mask_feat_stride))
    pos_bbox_preds = jax.random.uniform(k4, (N, 4), dtype=jnp.float32, minval=0.0, maxval=100.0)

    extra_infos = dict(
        num_fg=N,
        img_inds=jnp.array([0, 0, 1, 1], dtype=jnp.int32),
        pos_ctl_preds=pos_ctl_preds,
        pos_grid_positions=pos_grid_positions,
        pos_fpn_levels=jnp.array([0, 1, 2, 0], dtype=jnp.int32),
        pos_bbox_preds=pos_bbox_preds,
    )

    bbox_out, mask_out = dynamic_mask_head_forward(mask_feats, mask_feat_stride, extra_infos)
    for m in mask_out:
        jax.block_until_ready(m)
    for b in bbox_out:
        jax.block_until_ready(b)

    # sanity: shapes follow torch semantics (per-image lists, 128x128 masks)
    assert mask_out[0].shape == (2, 128, 128) and mask_out[1].shape == (2, 128, 128)
    assert bbox_out[0].shape == (2, 4)
    assert bool(jnp.all(jnp.isfinite(mask_out[0]))) and bool(jnp.all(jnp.isfinite(mask_out[1])))
    print("KERNEL_OK")
</pallas_src>

<mosaic_0001>
module attributes {stable_mosaic.version = 11 : i64} {
  func.func @kernel(%arg0: i32, %arg1: memref<8x4xf32, #tpu.memory_space<vmem>>, %arg2: memref<2x256xf32, #tpu.memory_space<vmem>>, %arg3: memref<8x8x256xf32, #tpu.memory_space<vmem>>, %arg4: memref<8x8x10xf32, #tpu.memory_space<vmem>>, %arg5: memref<8x8x1xf32, #tpu.memory_space<vmem>>, %arg6: memref<8x8x8xf32, #tpu.memory_space<vmem>>, %arg7: memref<8x8x1xf32, #tpu.memory_space<vmem>>, %arg8: memref<8x1x8xf32, #tpu.memory_space<vmem>>, %arg9: memref<8x1x1xf32, #tpu.memory_space<vmem>>, %arg10: memref<8x256xf32, #tpu.memory_space<vmem>>) attributes {dimension_semantics = [#tpu.dimension_semantics<parallel>], iteration_bounds = array<i64: 1>, scalar_prefetch = 0 : i64, scratch_operands = 0 : i64, tpu.core_type = #tpu.core_type<tc>, window_params = [{transform_indices = @transform_0, window_bounds = array<i64: 8, 4>}, {pipeline_mode = #tpu.pipeline_mode<synchronous>, transform_indices = @transform_1, window_bounds = array<i64: 2, 256>}, {transform_indices = @transform_2, window_bounds = array<i64: 8, 8, 256>}, {transform_indices = @transform_3, window_bounds = array<i64: 8, 8, 10>}, {transform_indices = @transform_4, window_bounds = array<i64: 8, 8, 1>}, {transform_indices = @transform_5, window_bounds = array<i64: 8, 8, 8>}, {transform_indices = @transform_6, window_bounds = array<i64: 8, 8, 1>}, {transform_indices = @transform_7, window_bounds = array<i64: 8, 1, 8>}, {transform_indices = @transform_8, window_bounds = array<i64: 8, 1, 1>}, {transform_indices = @transform_9, window_bounds = array<i64: 8, 256>}]} {
    %c0 = arith.constant 0 : index
    %c0_0 = arith.constant 0 : index
    %0 = vector.load %arg2[%c0, %c0_0] : memref<2x256xf32, #tpu.memory_space<vmem>>, vector<2x256xf32>
    %c0_1 = arith.constant 0 : index
    %c0_2 = arith.constant 0 : index
    %1 = vector.load %arg1[%c0_1, %c0_2] : memref<8x4xf32, #tpu.memory_space<vmem>>, vector<8x4xf32>
    %2 = vector.extract_strided_slice %1 {offsets = [0, 0], sizes = [8, 1], strides = [1, 1]} : vector<8x4xf32> to vector<8x1xf32>
    %3 = vector.extract_strided_slice %0 {offsets = [0, 0], sizes = [1, 256], strides = [1, 1]} : vector<2x256xf32> to vector<1x256xf32>
    %4 = vector.broadcast %2 : vector<8x1xf32> to vector<8x256xf32>
    %5 = vector.broadcast %3 : vector<1x256xf32> to vector<8x256xf32>
    %6 = arith.subf %4, %5 : vector<8x256xf32>
    %7 = vector.extract_strided_slice %1 {offsets = [0, 2], sizes = [8, 1], strides = [1, 1]} : vector<8x4xf32> to vector<8x1xf32>
    %8 = vector.broadcast %7 : vector<8x1xf32> to vector<8x256xf32>
    %9 = arith.mulf %6, %8 : vector<8x256xf32>
    %10 = vector.extract_strided_slice %1 {offsets = [0, 1], sizes = [8, 1], strides = [1, 1]} : vector<8x4xf32> to vector<8x1xf32>
    %11 = vector.extract_strided_slice %0 {offsets = [1, 0], sizes = [1, 256], strides = [1, 1]} : vector<2x256xf32> to vector<1x256xf32>
    %12 = vector.broadcast %10 : vector<8x1xf32> to vector<8x256xf32>
    %13 = vector.broadcast %11 : vector<1x256xf32> to vector<8x256xf32>
    %14 = arith.subf %12, %13 : vector<8x256xf32>
    %15 = vector.extract_strided_slice %1 {offsets = [0, 2], sizes = [8, 1], strides = [1, 1]} : vector<8x4xf32> to vector<8x1xf32>
    %16 = vector.broadcast %15 : vector<8x1xf32> to vector<8x256xf32>
    %17 = arith.mulf %14, %16 : vector<8x256xf32>
    %c0_3 = arith.constant 0 : index
    %c0_4 = arith.constant 0 : index
    %c0_5 = arith.constant 0 : index
    %18 = vector.load %arg3[%c0_3, %c0_4, %c0_5] : memref<8x8x256xf32, #tpu.memory_space<vmem>>, vector<1x8x256xf32>
    %19 = vector.shape_cast %18 : vector<1x8x256xf32> to vector<8x256xf32>
    %c0_6 = arith.constant 0 : index
    %c0_7 = arith.constant 0 : index
    %c0_8 = arith.constant 0 : index
    %20 = vector.load %arg4[%c0_6, %c0_7, %c0_8] : memref<8x8x10xf32, #tpu.memory_space<vmem>>, vector<1x8x10xf32>
    %21 = vector.shape_cast %20 : vector<1x8x10xf32> to vector<8x10xf32>
    %22 = vector.extract_strided_slice %21 {offsets = [0, 2], sizes = [8, 8], strides = [1, 1]} : vector<8x10xf32> to vector<8x8xf32>
    %cst = arith.constant dense<0.000000e+00> : vector<8x256xf32>
    %23 = tpu.matmul %22, %19, %cst {dimension_numbers = #tpu.dot_dimension_numbers<[1], [0], [0], [1], [0, 0, 1, 1], [], []>} : vector<8x8xf32>, vector<8x256xf32>, vector<8x256xf32> -> vector<8x256xf32>
    %24 = vector.extract_strided_slice %21 {offsets = [0, 0], sizes = [8, 1], strides = [1, 1]} : vector<8x10xf32> to vector<8x1xf32>
    %25 = vector.extract_strided_slice %9 {offsets = [0, 0], sizes = [1, 256], strides = [1, 1]} : vector<8x256xf32> to vector<1x256xf32>
    %26 = vector.broadcast %24 : vector<8x1xf32> to vector<8x256xf32>
    %27 = vector.broadcast %25 : vector<1x256xf32> to vector<8x256xf32>
    %28 = arith.mulf %26, %27 : vector<8x256xf32>
    %29 = arith.addf %23, %28 : vector<8x256xf32>
    %30 = vector.extract_strided_slice %21 {offsets = [0, 1], sizes = [8, 1], strides = [1, 1]} : vector<8x10xf32> to vector<8x1xf32>
    %31 = vector.extract_strided_slice %17 {offsets = [0, 0], sizes = [1, 256], strides = [1, 1]} : vector<8x256xf32> to vector<1x256xf32>
    %32 = vector.broadcast %30 : vector<8x1xf32> to vector<8x256xf32>
    %33 = vector.broadcast %31 : vector<1x256xf32> to vector<8x256xf32>
    %34 = arith.mulf %32, %33 : vector<8x256xf32>
    %35 = arith.addf %29, %34 : vector<8x256xf32>
    %c0_9 = arith.constant 0 : index
    %c0_10 = arith.constant 0 : index
    %c0_11 = arith.constant 0 : index
    %36 = vector.load %arg5[%c0_9, %c0_10, %c0_11] : memref<8x8x1xf32, #tpu.memory_space<vmem>>, vector<1x8x1xf32>
    %37 = vector.shape_cast %36 : vector<1x8x1xf32> to vector<8x1xf32>
    %38 = vector.broadcast %37 : vector<8x1xf32> to vector<8x256xf32>
    %39 = arith.addf %35, %38 : vector<8x256xf32>
    %cst_12 = arith.constant 0.000000e+00 : f32
    %40 = vector.broadcast %cst_12 : f32 to vector<8x256xf32>
    %41 = arith.subf %40, %39 : vector<8x256xf32>
    %42 = math.exp %41 : vector<8x256xf32>
    %cst_13 = arith.constant 1.000000e+00 : f32
    %43 = vector.broadcast %cst_13 : f32 to vector<8x256xf32>
    %44 = arith.addf %43, %42 : vector<8x256xf32>
    %45 = tpu.reciprocal %44 {approx = true} : vector<8x256xf32> -> vector<8x256xf32>
    %46 = arith.mulf %39, %45 : vector<8x256xf32>
    %c0_14 = arith.constant 0 : index
    %c0_15 = arith.constant 0 : index
    %c0_16 = arith.constant 0 : index
    %47 = vector.load %arg6[%c0_14, %c0_15, %c0_16] : memref<8x8x8xf32, #tpu.memory_space<vmem>>, vector<1x8x8xf32>
    %48 = vector.shape_cast %47 : vector<1x8x8xf32> to vector<8x8xf32>
    %cst_17 = arith.constant dense<0.000000e+00> : vector<8x256xf32>
    %49 = tpu.matmul %48, %46, %cst_17 {dimension_numbers = #tpu.dot_dimension_numbers<[1], [0], [0], [1], [0, 0, 1, 1], [], []>} : vector<8x8xf32>, vector<8x256xf32>, vector<8x256xf32> -> vector<8x256xf32>
    %c0_18 = arith.constant 0 : index
    %c0_19 = arith.constant 0 : index
    %c0_20 = arith.constant 0 : index
    %50 = vector.load %arg7[%c0_18, %c0_19, %c0_20] : memref<8x8x1xf32, #tpu.memory_space<vmem>>, vector<1x8x1xf32>
    %51 = vector.shape_cast %50 : vector<1x8x1xf32> to vector<8x1xf32>
    %52 = vector.broadcast %51 : vector<8x1xf32> to vector<8x256xf32>
    %53 = arith.addf %49, %52 : vector<8x256xf32>
    %cst_21 = arith.constant 0.000000e+00 : f32
    %54 = vector.broadcast %cst_21 : f32 to vector<8x256xf32>
    %55 = arith.subf %54, %53 : vector<8x256xf32>
    %56 = math.exp %55 : vector<8x256xf32>
    %cst_22 = arith.constant 1.000000e+00 : f32
    %57 = vector.broadcast %cst_22 : f32 to vector<8x256xf32>
    %58 = arith.addf %57, %56 : vector<8x256xf32>
    %59 = tpu.reciprocal %58 {approx = true} : vector<8x256xf32> -> vector<8x256xf32>
    %60 = arith.mulf %53, %59 : vector<8x256xf32>
    %c0_23 = arith.constant 0 : index
    %c0_24 = arith.constant 0 : index
    %c0_25 = arith.constant 0 : index
    %61 = vector.load %arg8[%c0_23, %c0_24, %c0_25] : memref<8x1x8xf32, #tpu.memory_space<vmem>>, vector<1x1x8xf32>
    %62 = vector.shape_cast %61 : vector<1x1x8xf32> to vector<1x8xf32>
    %cst_26 = arith.constant dense<0.000000e+00> : vector<1x256xf32>
    %63 = tpu.matmul %62, %60, %cst_26 {dimension_numbers = #tpu.dot_dimension_numbers<[1], [0], [0], [1], [0, 0, 1, 1], [], []>} : vector<1x8xf32>, vector<8x256xf32>, vector<1x256xf32> -> vector<1x256xf32>
    %c0_27 = arith.constant 0 : index
    %c0_28 = arith.constant 0 : index
    %c0_29 = arith.constant 0 : index
    %64 = vector.load %arg9[%c0_27, %c0_28, %c0_29] : memref<8x1x1xf32, #tpu.memory_space<vmem>>, vector<1x1x1xf32>
    %65 = vector.shape_cast %64 : vector<1x1x1xf32> to vector<1x1xf32>
    %66 = vector.broadcast %65 : vector<1x1xf32> to vector<1x256xf32>
    %67 = arith.addf %63, %66 : vector<1x256xf32>
    %c0_30 = arith.constant 0 : index
    %c0_31 = arith.constant 0 : index
    %68 = vector.load %arg10[%c0_30, %c0_31] : memref<8x256xf32, #tpu.memory_space<vmem>>, vector<1x256xf32>
    tpu.vector_store %arg10[%c0_30, %c0_31], %67 {strides = array<i32>} : memref<8x256xf32, #tpu.memory_space<vmem>>, vector<1x256xf32>,
    %c1 = arith.constant 1 : index
    %c0_32 = arith.constant 0 : index
    %c0_33 = arith.constant 0 : index
    %69 = vector.load %arg3[%c1, %c0_32, %c0_33] : memref<8x8x256xf32, #tpu.memory_space<vmem>>, vector<1x8x256xf32>
    %70 = vector.shape_cast %69 : vector<1x8x256xf32> to vector<8x256xf32>
    %c1_34 = arith.constant 1 : index
    %c0_35 = arith.constant 0 : index
    %c0_36 = arith.constant 0 : index
    %71 = vector.load %arg4[%c1_34, %c0_35, %c0_36] : memref<8x8x10xf32, #tpu.memory_space<vmem>>, vector<1x8x10xf32>
    %72 = vector.shape_cast %71 : vector<1x8x10xf32> to vector<8x10xf32>
    %73 = vector.extract_strided_slice %72 {offsets = [0, 2], sizes = [8, 8], strides = [1, 1]} : vector<8x10xf32> to vector<8x8xf32>
    %cst_37 = arith.constant dense<0.000000e+00> : vector<8x256xf32>
    %74 = tpu.matmul %73, %70, %cst_37 {dimension_numbers = #tpu.dot_dimension_numbers<[1], [0], [0], [1], [0, 0, 1, 1], [], []>} : vector<8x8xf32>, vector<8x256xf32>, vector<8x256xf32> -> vector<8x256xf32>
    %75 = vector.extract_strided_slice %72 {offsets = [0, 0], sizes = [8, 1], strides = [1, 1]} : vector<8x10xf32> to vector<8x1xf32>
    %76 = vector.extract_strided_slice %9 {offsets = [1, 0], sizes = [1, 256], strides = [1, 1]} : vector<8x256xf32> to vector<1x256xf32>
    %77 = vector.broadcast %75 : vector<8x1xf32> to vector<8x256xf32>
    %78 = vector.broadcast %76 : vector<1x256xf32> to vector<8x256xf32>
    %79 = arith.mulf %77, %78 : vector<8x256xf32>
    %80 = arith.addf %74, %79 : vector<8x256xf32>
    %81 = vector.extract_strided_slice %72 {offsets = [0, 1], sizes = [8, 1], strides = [1, 1]} : vector<8x10xf32> to vector<8x1xf32>
    %82 = vector.extract_strided_slice %17 {offsets = [1, 0], sizes = [1, 256], strides = [1, 1]} : vector<8x256xf32> to vector<1x256xf32>
    %83 = vector.broadcast %81 : vector<8x1xf32> to vector<8x256xf32>
    %84 = vector.broadcast %82 : vector<1x256xf32> to vector<8x256xf32>
    %85 = arith.mulf %83, %84 : vector<8x256xf32>
    %86 = arith.addf %80, %85 : vector<8x256xf32>
    %c1_38 = arith.constant 1 : index
    %c0_39 = arith.constant 0 : index
    %c0_40 = arith.constant 0 : index
    %87 = vector.load %arg5[%c1_38, %c0_39, %c0_40] : memref<8x8x1xf32, #tpu.memory_space<vmem>>, vector<1x8x1xf32>
    %88 = vector.shape_cast %87 : vector<1x8x1xf32> to vector<8x1xf32>
    %89 = vector.broadcast %88 : vector<8x1xf32> to vector<8x256xf32>
    %90 = arith.addf %86, %89 : vector<8x256xf32>
    %cst_41 = arith.constant 0.000000e+00 : f32
    %91 = vector.broadcast %cst_41 : f32 to vector<8x256xf32>
    %92 = arith.subf %91, %90 : vector<8x256xf32>
    %93 = math.exp %92 : vector<8x256xf32>
    %cst_42 = arith.constant 1.000000e+00 : f32
    %94 = vector.broadcast %cst_42 : f32 to vector<8x256xf32>
    %95 = arith.addf %94, %93 : vector<8x256xf32>
    %96 = tpu.reciprocal %95 {approx = true} : vector<8x256xf32> -> vector<8x256xf32>
    %97 = arith.mulf %90, %96 : vector<8x256xf32>
    %c1_43 = arith.constant 1 : index
    %c0_44 = arith.constant 0 : index
    %c0_45 = arith.constant 0 : index
    %98 = vector.load %arg6[%c1_43, %c0_44, %c0_45] : memref<8x8x8xf32, #tpu.memory_space<vmem>>, vector<1x8x8xf32>
    %99 = vector.shape_cast %98 : vector<1x8x8xf32> to vector<8x8xf32>
    %cst_46 = arith.constant dense<0.000000e+00> : vector<8x256xf32>
    %100 = tpu.matmul %99, %97, %cst_46 {dimension_numbers = #tpu.dot_dimension_numbers<[1], [0], [0], [1], [0, 0, 1, 1], [], []>} : vector<8x8xf32>, vector<8x256xf32>, vector<8x256xf32> -> vector<8x256xf32>
    %c1_47 = arith.constant 1 : index
    %c0_48 = arith.constant 0 : index
    %c0_49 = arith.constant 0 : index
    %101 = vector.load %arg7[%c1_47, %c0_48, %c0_49] : memref<8x8x1xf32, #tpu.memory_space<vmem>>, vector<1x8x1xf32>
    %102 = vector.shape_cast %101 : vector<1x8x1xf32> to vector<8x1xf32>
    %103 = vector.broadcast %102 : vector<8x1xf32> to vector<8x256xf32>
    %104 = arith.addf %100, %103 : vector<8x256xf32>
    %cst_50 = arith.constant 0.000000e+00 : f32
    %105 = vector.broadcast %cst_50 : f32 to vector<8x256xf32>
    %106 = arith.subf %105, %104 : vector<8x256xf32>
    %107 = math.exp %106 : vector<8x256xf32>
    %cst_51 = arith.constant 1.000000e+00 : f32
    %108 = vector.broadcast %cst_51 : f32 to vector<8x256xf32>
    %109 = arith.addf %108, %107 : vector<8x256xf32>
    %110 = tpu.reciprocal %109 {approx = true} : vector<8x256xf32> -> vector<8x256xf32>
    %111 = arith.mulf %104, %110 : vector<8x256xf32>
    %c1_52 = arith.constant 1 : index
    %c0_53 = arith.constant 0 : index
    %c0_54 = arith.constant 0 : index
    %112 = vector.load %arg8[%c1_52, %c0_53, %c0_54] : memref<8x1x8xf32, #tpu.memory_space<vmem>>, vector<1x1x8xf32>
    %113 = vector.shape_cast %112 : vector<1x1x8xf32> to vector<1x8xf32>
    %cst_55 = arith.constant dense<0.000000e+00> : vector<1x256xf32>
    %114 = tpu.matmul %113, %111, %cst_55 {dimension_numbers = #tpu.dot_dimension_numbers<[1], [0], [0], [1], [0, 0, 1, 1], [], []>} : vector<1x8xf32>, vector<8x256xf32>, vector<1x256xf32> -> vector<1x256xf32>
    %c1_56 = arith.constant 1 : index
    %c0_57 = arith.constant 0 : index
    %c0_58 = arith.constant 0 : index
    %115 = vector.load %arg9[%c1_56, %c0_57, %c0_58] : memref<8x1x1xf32, #tpu.memory_space<vmem>>, vector<1x1x1xf32>
    %116 = vector.shape_cast %115 : vector<1x1x1xf32> to vector<1x1xf32>
    %117 = vector.broadcast %116 : vector<1x1xf32> to vector<1x256xf32>
    %118 = arith.addf %114, %117 : vector<1x256xf32>
    %c1_59 = arith.constant 1 : index
    %c0_60 = arith.constant 0 : index
    %119 = vector.load %arg10[%c1_59, %c0_60] : memref<8x256xf32, #tpu.memory_space<vmem>>, vector<1x256xf32>
    tpu.vector_store %arg10[%c1_59, %c0_60], %118 {strides = array<i32>} : memref<8x256xf32, #tpu.memory_space<vmem>>, vector<1x256xf32>,
    %c2 = arith.constant 2 : index
    %c0_61 = arith.constant 0 : index
    %c0_62 = arith.constant 0 : index
    %120 = vector.load %arg3[%c2, %c0_61, %c0_62] : memref<8x8x256xf32, #tpu.memory_space<vmem>>, vector<1x8x256xf32>
    %121 = vector.shape_cast %120 : vector<1x8x256xf32> to vector<8x256xf32>
    %c2_63 = arith.constant 2 : index
    %c0_64 = arith.constant 0 : index
    %c0_65 = arith.constant 0 : index
    %122 = vector.load %arg4[%c2_63, %c0_64, %c0_65] : memref<8x8x10xf32, #tpu.memory_space<vmem>>, vector<1x8x10xf32>
    %123 = vector.shape_cast %122 : vector<1x8x10xf32> to vector<8x10xf32>
    %124 = vector.extract_strided_slice %123 {offsets = [0, 2], sizes = [8, 8], strides = [1, 1]} : vector<8x10xf32> to vector<8x8xf32>
    %cst_66 = arith.constant dense<0.000000e+00> : vector<8x256xf32>
    %125 = tpu.matmul %124, %121, %cst_66 {dimension_numbers = #tpu.dot_dimension_numbers<[1], [0], [0], [1], [0, 0, 1, 1], [], []>} : vector<8x8xf32>, vector<8x256xf32>, vector<8x256xf32> -> vector<8x256xf32>
    %126 = vector.extract_strided_slice %123 {offsets = [0, 0], sizes = [8, 1], strides = [1, 1]} : vector<8x10xf32> to vector<8x1xf32>
    %127 = vector.extract_strided_slice %9 {offsets = [2, 0], sizes = [1, 256], strides = [1, 1]} : vector<8x256xf32> to vector<1x256xf32>
    %128 = vector.broadcast %126 : vector<8x1xf32> to vector<8x256xf32>
    %129 = vector.broadcast %127 : vector<1x256xf32> to vector<8x256xf32>
    %130 = arith.mulf %128, %129 : vector<8x256xf32>
    %131 = arith.addf %125, %130 : vector<8x256xf32>
    %132 = vector.extract_strided_slice %123 {offsets = [0, 1], sizes = [8, 1], strides = [1, 1]} : vector<8x10xf32> to vector<8x1xf32>
    %133 = vector.extract_strided_slice %17 {offsets = [2, 0], sizes = [1, 256], strides = [1, 1]} : vector<8x256xf32> to vector<1x256xf32>
    %134 = vector.broadcast %132 : vector<8x1xf32> to vector<8x256xf32>
    %135 = vector.broadcast %133 : vector<1x256xf32> to vector<8x256xf32>
    %136 = arith.mulf %134, %135 : vector<8x256xf32>
    %137 = arith.addf %131, %136 : vector<8x256xf32>
    %c2_67 = arith.constant 2 : index
    %c0_68 = arith.constant 0 : index
    %c0_69 = arith.constant 0 : index
    %138 = vector.load %arg5[%c2_67, %c0_68, %c0_69] : memref<8x8x1xf32, #tpu.memory_space<vmem>>, vector<1x8x1xf32>
    %139 = vector.shape_cast %138 : vector<1x8x1xf32> to vector<8x1xf32>
    %140 = vector.broadcast %139 : vector<8x1xf32> to vector<8x256xf32>
    %141 = arith.addf %137, %140 : vector<8x256xf32>
    %cst_70 = arith.constant 0.000000e+00 : f32
    %142 = vector.broadcast %cst_70 : f32 to vector<8x256xf32>
    %143 = arith.subf %142, %141 : vector<8x256xf32>
    %144 = math.exp %143 : vector<8x256xf32>
    %cst_71 = arith.constant 1.000000e+00 : f32
    %145 = vector.broadcast %cst_71 : f32 to vector<8x256xf32>
    %146 = arith.addf %145, %144 : vector<8x256xf32>
    %147 = tpu.reciprocal %146 {approx = true} : vector<8x256xf32> -> vector<8x256xf32>
    %148 = arith.mulf %141, %147 : vector<8x256xf32>
    %c2_72 = arith.constant 2 : index
    %c0_73 = arith.constant 0 : index
    %c0_74 = arith.constant 0 : index
    %149 = vector.load %arg6[%c2_72, %c0_73, %c0_74] : memref<8x8x8xf32, #tpu.memory_space<vmem>>, vector<1x8x8xf32>
    %150 = vector.shape_cast %149 : vector<1x8x8xf32> to vector<8x8xf32>
    %cst_75 = arith.constant dense<0.000000e+00> : vector<8x256xf32>
    %151 = tpu.matmul %150, %148, %cst_75 {dimension_numbers = #tpu.dot_dimension_numbers<[1], [0], [0], [1], [0, 0, 1, 1], [], []>} : vector<8x8xf32>, vector<8x256xf32>, vector<8x256xf32> -> vector<8x256xf32>
    %c2_76 = arith.constant 2 : index
    %c0_77 = arith.constant 0 : index
    %c0_78 = arith.constant 0 : index
    %152 = vector.load %arg7[%c2_76, %c0_77, %c0_78] : memref<8x8x1xf32, #tpu.memory_space<vmem>>, vector<1x8x1xf32>
    %153 = vector.shape_cast %152 : vector<1x8x1xf32> to vector<8x1xf32>
    %154 = vector.broadcast %153 : vector<8x1xf32> to vector<8x256xf32>
    %155 = arith.addf %151, %154 : vector<8x256xf32>
    %cst_79 = arith.constant 0.000000e+00 : f32
    %156 = vector.broadcast %cst_79 : f32 to vector<8x256xf32>
    %157 = arith.subf %156, %155 : vector<8x256xf32>
    %158 = math.exp %157 : vector<8x256xf32>
    %cst_80 = arith.constant 1.000000e+00 : f32
    %159 = vector.broadcast %cst_80 : f32 to vector<8x256xf32>
    %160 = arith.addf %159, %158 : vector<8x256xf32>
    %161 = tpu.reciprocal %160 {approx = true} : vector<8x256xf32> -> vector<8x256xf32>
    %162 = arith.mulf %155, %161 : vector<8x256xf32>
    %c2_81 = arith.constant 2 : index
    %c0_82 = arith.constant 0 : index
    %c0_83 = arith.constant 0 : index
    %163 = vector.load %arg8[%c2_81, %c0_82, %c0_83] : memref<8x1x8xf32, #tpu.memory_space<vmem>>, vector<1x1x8xf32>
    %164 = vector.shape_cast %163 : vector<1x1x8xf32> to vector<1x8xf32>
    %cst_84 = arith.constant dense<0.000000e+00> : vector<1x256xf32>
    %165 = tpu.matmul %164, %162, %cst_84 {dimension_numbers = #tpu.dot_dimension_numbers<[1], [0], [0], [1], [0, 0, 1, 1], [], []>} : vector<1x8xf32>, vector<8x256xf32>, vector<1x256xf32> -> vector<1x256xf32>
    %c2_85 = arith.constant 2 : index
    %c0_86 = arith.constant 0 : index
    %c0_87 = arith.constant 0 : index
    %166 = vector.load %arg9[%c2_85, %c0_86, %c0_87] : memref<8x1x1xf32, #tpu.memory_space<vmem>>, vector<1x1x1xf32>
    %167 = vector.shape_cast %166 : vector<1x1x1xf32> to vector<1x1xf32>
    %168 = vector.broadcast %167 : vector<1x1xf32> to vector<1x256xf32>
    %169 = arith.addf %165, %168 : vector<1x256xf32>
    %c2_88 = arith.constant 2 : index
    %c0_89 = arith.constant 0 : index
    %170 = vector.load %arg10[%c2_88, %c0_89] : memref<8x256xf32, #tpu.memory_space<vmem>>, vector<1x256xf32>
    tpu.vector_store %arg10[%c2_88, %c0_89], %169 {strides = array<i32>} : memref<8x256xf32, #tpu.memory_space<vmem>>, vector<1x256xf32>,
    %c3 = arith.constant 3 : index
    %c0_90 = arith.constant 0 : index
    %c0_91 = arith.constant 0 : index
    %171 = vector.load %arg3[%c3, %c0_90, %c0_91] : memref<8x8x256xf32, #tpu.memory_space<vmem>>, vector<1x8x256xf32>
    %172 = vector.shape_cast %171 : vector<1x8x256xf32> to vector<8x256xf32>
    %c3_92 = arith.constant 3 : index
    %c0_93 = arith.constant 0 : index
    %c0_94 = arith.constant 0 : index
    %173 = vector.load %arg4[%c3_92, %c0_93, %c0_94] : memref<8x8x10xf32, #tpu.memory_space<vmem>>, vector<1x8x10xf32>
    %174 = vector.shape_cast %173 : vector<1x8x10xf32> to vector<8x10xf32>
    %175 = vector.extract_strided_slice %174 {offsets = [0, 2], sizes = [8, 8], strides = [1, 1]} : vector<8x10xf32> to vector<8x8xf32>
    %cst_95 = arith.constant dense<0.000000e+00> : vector<8x256xf32>
    %176 = tpu.matmul %175, %172, %cst_95 {dimension_numbers = #tpu.dot_dimension_numbers<[1], [0], [0], [1], [0, 0, 1, 1], [], []>} : vector<8x8xf32>, vector<8x256xf32>, vector<8x256xf32> -> vector<8x256xf32>
    %177 = vector.extract_strided_slice %174 {offsets = [0, 0], sizes = [8, 1], strides = [1, 1]} : vector<8x10xf32> to vector<8x1xf32>
    %178 = vector.extract_strided_slice %9 {offsets = [3, 0], sizes = [1, 256], strides = [1, 1]} : vector<8x256xf32> to vector<1x256xf32>
    %179 = vector.broadcast %177 : vector<8x1xf32> to vector<8x256xf32>
    %180 = vector.broadcast %178 : vector<1x256xf32> to vector<8x256xf32>
    %181 = arith.mulf %179, %180 : vector<8x256xf32>
    %182 = arith.addf %176, %181 : vector<8x256xf32>
    %183 = vector.extract_strided_slice %174 {offsets = [0, 1], sizes = [8, 1], strides = [1, 1]} : vector<8x10xf32> to vector<8x1xf32>
    %184 = vector.extract_strided_slice %17 {offsets = [3, 0], sizes = [1, 256], strides = [1, 1]} : vector<8x256xf32> to vector<1x256xf32>
    %185 = vector.broadcast %183 : vector<8x1xf32> to vector<8x256xf32>
    %186 = vector.broadcast %184 : vector<1x256xf32> to vector<8x256xf32>
    %187 = arith.mulf %185, %186 : vector<8x256xf32>
    %188 = arith.addf %182, %187 : vector<8x256xf32>
    %c3_96 = arith.constant 3 : index
    %c0_97 = arith.constant 0 : index
    %c0_98 = arith.constant 0 : index
    %189 = vector.load %arg5[%c3_96, %c0_97, %c0_98] : memref<8x8x1xf32, #tpu.memory_space<vmem>>, vector<1x8x1xf32>
    %190 = vector.shape_cast %189 : vector<1x8x1xf32> to vector<8x1xf32>
    %191 = vector.broadcast %190 : vector<8x1xf32> to vector<8x256xf32>
    %192 = arith.addf %188, %191 : vector<8x256xf32>
    %cst_99 = arith.constant 0.000000e+00 : f32
    %193 = vector.broadcast %cst_99 : f32 to vector<8x256xf32>
    %194 = arith.subf %193, %192 : vector<8x256xf32>
    %195 = math.exp %194 : vector<8x256xf32>
    %cst_100 = arith.constant 1.000000e+00 : f32
    %196 = vector.broadcast %cst_100 : f32 to vector<8x256xf32>
    %197 = arith.addf %196, %195 : vector<8x256xf32>
    %198 = tpu.reciprocal %197 {approx = true} : vector<8x256xf32> -> vector<8x256xf32>
    %199 = arith.mulf %192, %198 : vector<8x256xf32>
    %c3_101 = arith.constant 3 : index
    %c0_102 = arith.constant 0 : index
    %c0_103 = arith.constant 0 : index
    %200 = vector.load %arg6[%c3_101, %c0_102, %c0_103] : memref<8x8x8xf32, #tpu.memory_space<vmem>>, vector<1x8x8xf32>
    %201 = vector.shape_cast %200 : vector<1x8x8xf32> to vector<8x8xf32>
    %cst_104 = arith.constant dense<0.000000e+00> : vector<8x256xf32>
    %202 = tpu.matmul %201, %199, %cst_104 {dimension_numbers = #tpu.dot_dimension_numbers<[1], [0], [0], [1], [0, 0, 1, 1], [], []>} : vector<8x8xf32>, vector<8x256xf32>, vector<8x256xf32> -> vector<8x256xf32>
    %c3_105 = arith.constant 3 : index
    %c0_106 = arith.constant 0 : index
    %c0_107 = arith.constant 0 : index
    %203 = vector.load %arg7[%c3_105, %c0_106, %c0_107] : memref<8x8x1xf32, #tpu.memory_space<vmem>>, vector<1x8x1xf32>
    %204 = vector.shape_cast %203 : vector<1x8x1xf32> to vector<8x1xf32>
    %205 = vector.broadcast %204 : vector<8x1xf32> to vector<8x256xf32>
    %206 = arith.addf %202, %205 : vector<8x256xf32>
    %cst_108 = arith.constant 0.000000e+00 : f32
    %207 = vector.broadcast %cst_108 : f32 to vector<8x256xf32>
    %208 = arith.subf %207, %206 : vector<8x256xf32>
    %209 = math.exp %208 : vector<8x256xf32>
    %cst_109 = arith.constant 1.000000e+00 : f32
    %210 = vector.broadcast %cst_109 : f32 to vector<8x256xf32>
    %211 = arith.addf %210, %209 : vector<8x256xf32>
    %212 = tpu.reciprocal %211 {approx = true} : vector<8x256xf32> -> vector<8x256xf32>
    %213 = arith.mulf %206, %212 : vector<8x256xf32>
    %c3_110 = arith.constant 3 : index
    %c0_111 = arith.constant 0 : index
    %c0_112 = arith.constant 0 : index
    %214 = vector.load %arg8[%c3_110, %c0_111, %c0_112] : memref<8x1x8xf32, #tpu.memory_space<vmem>>, vector<1x1x8xf32>
    %215 = vector.shape_cast %214 : vector<1x1x8xf32> to vector<1x8xf32>
    %cst_113 = arith.constant dense<0.000000e+00> : vector<1x256xf32>
    %216 = tpu.matmul %215, %213, %cst_113 {dimension_numbers = #tpu.dot_dimension_numbers<[1], [0], [0], [1], [0, 0, 1, 1], [], []>} : vector<1x8xf32>, vector<8x256xf32>, vector<1x256xf32> -> vector<1x256xf32>
    %c3_114 = arith.constant 3 : index
    %c0_115 = arith.constant 0 : index
    %c0_116 = arith.constant 0 : index
    %217 = vector.load %arg9[%c3_114, %c0_115, %c0_116] : memref<8x1x1xf32, #tpu.memory_space<vmem>>, vector<1x1x1xf32>
    %218 = vector.shape_cast %217 : vector<1x1x1xf32> to vector<1x1xf32>
    %219 = vector.broadcast %218 : vector<1x1xf32> to vector<1x256xf32>
    %220 = arith.addf %216, %219 : vector<1x256xf32>
    %c3_117 = arith.constant 3 : index
    %c0_118 = arith.constant 0 : index
    %221 = vector.load %arg10[%c3_117, %c0_118] : memref<8x256xf32, #tpu.memory_space<vmem>>, vector<1x256xf32>
    tpu.vector_store %arg10[%c3_117, %c0_118], %220 {strides = array<i32>} : memref<8x256xf32, #tpu.memory_space<vmem>>, vector<1x256xf32>,
    %c4 = arith.constant 4 : index
    %c0_119 = arith.constant 0 : index
    %c0_120 = arith.constant 0 : index
    %222 = vector.load %arg3[%c4, %c0_119, %c0_120] : memref<8x8x256xf32, #tpu.memory_space<vmem>>, vector<1x8x256xf32>
    %223 = vector.shape_cast %222 : vector<1x8x256xf32> to vector<8x256xf32>
    %c4_121 = arith.constant 4 : index
    %c0_122 = arith.constant 0 : index
    %c0_123 = arith.constant 0 : index
    %224 = vector.load %arg4[%c4_121, %c0_122, %c0_123] : memref<8x8x10xf32, #tpu.memory_space<vmem>>, vector<1x8x10xf32>
    %225 = vector.shape_cast %224 : vector<1x8x10xf32> to vector<8x10xf32>
    %226 = vector.extract_strided_slice %225 {offsets = [0, 2], sizes = [8, 8], strides = [1, 1]} : vector<8x10xf32> to vector<8x8xf32>
    %cst_124 = arith.constant dense<0.000000e+00> : vector<8x256xf32>
    %227 = tpu.matmul %226, %223, %cst_124 {dimension_numbers = #tpu.dot_dimension_numbers<[1], [0], [0], [1], [0, 0, 1, 1], [], []>} : vector<8x8xf32>, vector<8x256xf32>, vector<8x256xf32> -> vector<8x256xf32>
    %228 = vector.extract_strided_slice %225 {offsets = [0, 0], sizes = [8, 1], strides = [1, 1]} : vector<8x10xf32> to vector<8x1xf32>
    %229 = vector.extract_strided_slice %9 {offsets = [4, 0], sizes = [1, 256], strides = [1, 1]} : vector<8x256xf32> to vector<1x256xf32>
    %230 = vector.broadcast %228 : vector<8x1xf32> to vector<8x256xf32>
    %231 = vector.broadcast %229 : vector<1x256xf32> to vector<8x256xf32>
    %232 = arith.mulf %230, %231 : vector<8x256xf32>
    %233 = arith.addf %227, %232 : vector<8x256xf32>
    %234 = vector.extract_strided_slice %225 {offsets = [0, 1], sizes = [8, 1], strides = [1, 1]} : vector<8x10xf32> to vector<8x1xf32>
    %235 = vector.extract_strided_slice %17 {offsets = [4, 0], sizes = [1, 256], strides = [1, 1]} : vector<8x256xf32> to vector<1x256xf32>
    %236 = vector.broadcast %234 : vector<8x1xf32> to vector<8x256xf32>
    %237 = vector.broadcast %235 : vector<1x256xf32> to vector<8x256xf32>
    %238 = arith.mulf %236, %237 : vector<8x256xf32>
    %239 = arith.addf %233, %238 : vector<8x256xf32>
    %c4_125 = arith.constant 4 : index
    %c0_126 = arith.constant 0 : index
    %c0_127 = arith.constant 0 : index
    %240 = vector.load %arg5[%c4_125, %c0_126, %c0_127] : memref<8x8x1xf32, #tpu.memory_space<vmem>>, vector<1x8x1xf32>
    %241 = vector.shape_cast %240 : vector<1x8x1xf32> to vector<8x1xf32>
    %242 = vector.broadcast %241 : vector<8x1xf32> to vector<8x256xf32>
    %243 = arith.addf %239, %242 : vector<8x256xf32>
    %cst_128 = arith.constant 0.000000e+00 : f32
    %244 = vector.broadcast %cst_128 : f32 to vector<8x256xf32>
    %245 = arith.subf %244, %243 : vector<8x256xf32>
    %246 = math.exp %245 : vector<8x256xf32>
    %cst_129 = arith.constant 1.000000e+00 : f32
    %247 = vector.broadcast %cst_129 : f32 to vector<8x256xf32>
    %248 = arith.addf %247, %246 : vector<8x256xf32>
    %249 = tpu.reciprocal %248 {approx = true} : vector<8x256xf32> -> vector<8x256xf32>
    %250 = arith.mulf %243, %249 : vector<8x256xf32>
    %c4_130 = arith.constant 4 : index
    %c0_131 = arith.constant 0 : index
    %c0_132 = arith.constant 0 : index
    %251 = vector.load %arg6[%c4_130, %c0_131, %c0_132] : memref<8x8x8xf32, #tpu.memory_space<vmem>>, vector<1x8x8xf32>
    %252 = vector.shape_cast %251 : vector<1x8x8xf32> to vector<8x8xf32>
    %cst_133 = arith.constant dense<0.000000e+00> : vector<8x256xf32>
    %253 = tpu.matmul %252, %250, %cst_133 {dimension_numbers = #tpu.dot_dimension_numbers<[1], [0], [0], [1], [0, 0, 1, 1], [], []>} : vector<8x8xf32>, vector<8x256xf32>, vector<8x256xf32> -> vector<8x256xf32>
    %c4_134 = arith.constant 4 : index
    %c0_135 = arith.constant 0 : index
    %c0_136 = arith.constant 0 : index
    %254 = vector.load %arg7[%c4_134, %c0_135, %c0_136] : memref<8x8x1xf32, #tpu.memory_space<vmem>>, vector<1x8x1xf32>
    %255 = vector.shape_cast %254 : vector<1x8x1xf32> to vector<8x1xf32>
    %256 = vector.broadcast %255 : vector<8x1xf32> to vector<8x256xf32>
    %257 = arith.addf %253, %256 : vector<8x256xf32>
    %cst_137 = arith.constant 0.000000e+00 : f32
    %258 = vector.broadcast %cst_137 : f32 to vector<8x256xf32>
    %259 = arith.subf %258, %257 : vector<8x256xf32>
    %260 = math.exp %259 : vector<8x256xf32>
    %cst_138 = arith.constant 1.000000e+00 : f32
    %261 = vector.broadcast %cst_138 : f32 to vector<8x256xf32>
    %262 = arith.addf %261, %260 : vector<8x256xf32>
    %263 = tpu.reciprocal %262 {approx = true} : vector<8x256xf32> -> vector<8x256xf32>
    %264 = arith.mulf %257, %263 : vector<8x256xf32>
    %c4_139 = arith.constant 4 : index
    %c0_140 = arith.constant 0 : index
    %c0_141 = arith.constant 0 : index
    %265 = vector.load %arg8[%c4_139, %c0_140, %c0_141] : memref<8x1x8xf32, #tpu.memory_space<vmem>>, vector<1x1x8xf32>
    %266 = vector.shape_cast %265 : vector<1x1x8xf32> to vector<1x8xf32>
    %cst_142 = arith.constant dense<0.000000e+00> : vector<1x256xf32>
    %267 = tpu.matmul %266, %264, %cst_142 {dimension_numbers = #tpu.dot_dimension_numbers<[1], [0], [0], [1], [0, 0, 1, 1], [], []>} : vector<1x8xf32>, vector<8x256xf32>, vector<1x256xf32> -> vector<1x256xf32>
    %c4_143 = arith.constant 4 : index
    %c0_144 = arith.constant 0 : index
    %c0_145 = arith.constant 0 : index
    %268 = vector.load %arg9[%c4_143, %c0_144, %c0_145] : memref<8x1x1xf32, #tpu.memory_space<vmem>>, vector<1x1x1xf32>
    %269 = vector.shape_cast %268 : vector<1x1x1xf32> to vector<1x1xf32>
    %270 = vector.broadcast %269 : vector<1x1xf32> to vector<1x256xf32>
    %271 = arith.addf %267, %270 : vector<1x256xf32>
    %c4_146 = arith.constant 4 : index
    %c0_147 = arith.constant 0 : index
    %272 = vector.load %arg10[%c4_146, %c0_147] : memref<8x256xf32, #tpu.memory_space<vmem>>, vector<1x256xf32>
    tpu.vector_store %arg10[%c4_146, %c0_147], %271 {strides = array<i32>} : memref<8x256xf32, #tpu.memory_space<vmem>>, vector<1x256xf32>,
    %c5 = arith.constant 5 : index
    %c0_148 = arith.constant 0 : index
    %c0_149 = arith.constant 0 : index
    %273 = vector.load %arg3[%c5, %c0_148, %c0_149] : memref<8x8x256xf32, #tpu.memory_space<vmem>>, vector<1x8x256xf32>
    %274 = vector.shape_cast %273 : vector<1x8x256xf32> to vector<8x256xf32>
    %c5_150 = arith.constant 5 : index
    %c0_151 = arith.constant 0 : index
    %c0_152 = arith.constant 0 : index
    %275 = vector.load %arg4[%c5_150, %c0_151, %c0_152] : memref<8x8x10xf32, #tpu.memory_space<vmem>>, vector<1x8x10xf32>
    %276 = vector.shape_cast %275 : vector<1x8x10xf32> to vector<8x10xf32>
    %277 = vector.extract_strided_slice %276 {offsets = [0, 2], sizes = [8, 8], strides = [1, 1]} : vector<8x10xf32> to vector<8x8xf32>
    %cst_153 = arith.constant dense<0.000000e+00> : vector<8x256xf32>
    %278 = tpu.matmul %277, %274, %cst_153 {dimension_numbers = #tpu.dot_dimension_numbers<[1], [0], [0], [1], [0, 0, 1, 1], [], []>} : vector<8x8xf32>, vector<8x256xf32>, vector<8x256xf32> -> vector<8x256xf32>
    %279 = vector.extract_strided_slice %276 {offsets = [0, 0], sizes = [8, 1], strides = [1, 1]} : vector<8x10xf32> to vector<8x1xf32>
    %280 = vector.extract_strided_slice %9 {offsets = [5, 0], sizes = [1, 256], strides = [1, 1]} : vector<8x256xf32> to vector<1x256xf32>
    %281 = vector.broadcast %279 : vector<8x1xf32> to vector<8x256xf32>
    %282 = vector.broadcast %280 : vector<1x256xf32> to vector<8x256xf32>
    %283 = arith.mulf %281, %282 : vector<8x256xf32>
    %284 = arith.addf %278, %283 : vector<8x256xf32>
    %285 = vector.extract_strided_slice %276 {offsets = [0, 1], sizes = [8, 1], strides = [1, 1]} : vector<8x10xf32> to vector<8x1xf32>
    %286 = vector.extract_strided_slice %17 {offsets = [5, 0], sizes = [1, 256], strides = [1, 1]} : vector<8x256xf32> to vector<1x256xf32>
    %287 = vector.broadcast %285 : vector<8x1xf32> to vector<8x256xf32>
    %288 = vector.broadcast %286 : vector<1x256xf32> to vector<8x256xf32>
    %289 = arith.mulf %287, %288 : vector<8x256xf32>
    %290 = arith.addf %284, %289 : vector<8x256xf32>
    %c5_154 = arith.constant 5 : index
    %c0_155 = arith.constant 0 : index
    %c0_156 = arith.constant 0 : index
    %291 = vector.load %arg5[%c5_154, %c0_155, %c0_156] : memref<8x8x1xf32, #tpu.memory_space<vmem>>, vector<1x8x1xf32>
    %292 = vector.shape_cast %291 : vector<1x8x1xf32> to vector<8x1xf32>
    %293 = vector.broadcast %292 : vector<8x1xf32> to vector<8x256xf32>
    %294 = arith.addf %290, %293 : vector<8x256xf32>
    %cst_157 = arith.constant 0.000000e+00 : f32
    %295 = vector.broadcast %cst_157 : f32 to vector<8x256xf32>
    %296 = arith.subf %295, %294 : vector<8x256xf32>
    %297 = math.exp %296 : vector<8x256xf32>
    %cst_158 = arith.constant 1.000000e+00 : f32
    %298 = vector.broadcast %cst_158 : f32 to vector<8x256xf32>
    %299 = arith.addf %298, %297 : vector<8x256xf32>
    %300 = tpu.reciprocal %299 {approx = true} : vector<8x256xf32> -> vector<8x256xf32>
    %301 = arith.mulf %294, %300 : vector<8x256xf32>
    %c5_159 = arith.constant 5 : index
    %c0_160 = arith.constant 0 : index
    %c0_161 = arith.constant 0 : index
    %302 = vector.load %arg6[%c5_159, %c0_160, %c0_161] : memref<8x8x8xf32, #tpu.memory_space<vmem>>, vector<1x8x8xf32>
    %303 = vector.shape_cast %302 : vector<1x8x8xf32> to vector<8x8xf32>
    %cst_162 = arith.constant dense<0.000000e+00> : vector<8x256xf32>
    %304 = tpu.matmul %303, %301, %cst_162 {dimension_numbers = #tpu.dot_dimension_numbers<[1], [0], [0], [1], [0, 0, 1, 1], [], []>} : vector<8x8xf32>, vector<8x256xf32>, vector<8x256xf32> -> vector<8x256xf32>
    %c5_163 = arith.constant 5 : index
    %c0_164 = arith.constant 0 : index
    %c0_165 = arith.constant 0 : index
    %305 = vector.load %arg7[%c5_163, %c0_164, %c0_165] : memref<8x8x1xf32, #tpu.memory_space<vmem>>, vector<1x8x1xf32>
    %306 = vector.shape_cast %305 : vector<1x8x1xf32> to vector<8x1xf32>
    %307 = vector.broadcast %306 : vector<8x1xf32> to vector<8x256xf32>
    %308 = arith.addf %304, %307 : vector<8x256xf32>
    %cst_166 = arith.constant 0.000000e+00 : f32
    %309 = vector.broadcast %cst_166 : f32 to vector<8x256xf32>
    %310 = arith.subf %309, %308 : vector<8x256xf32>
    %311 = math.exp %310 : vector<8x256xf32>
    %cst_167 = arith.constant 1.000000e+00 : f32
    %312 = vector.broadcast %cst_167 : f32 to vector<8x256xf32>
    %313 = arith.addf %312, %311 : vector<8x256xf32>
    %314 = tpu.reciprocal %313 {approx = true} : vector<8x256xf32> -> vector<8x256xf32>
    %315 = arith.mulf %308, %314 : vector<8x256xf32>
    %c5_168 = arith.constant 5 : index
    %c0_169 = arith.constant 0 : index
    %c0_170 = arith.constant 0 : index
    %316 = vector.load %arg8[%c5_168, %c0_169, %c0_170] : memref<8x1x8xf32, #tpu.memory_space<vmem>>, vector<1x1x8xf32>
    %317 = vector.shape_cast %316 : vector<1x1x8xf32> to vector<1x8xf32>
    %cst_171 = arith.constant dense<0.000000e+00> : vector<1x256xf32>
    %318 = tpu.matmul %317, %315, %cst_171 {dimension_numbers = #tpu.dot_dimension_numbers<[1], [0], [0], [1], [0, 0, 1, 1], [], []>} : vector<1x8xf32>, vector<8x256xf32>, vector<1x256xf32> -> vector<1x256xf32>
    %c5_172 = arith.constant 5 : index
    %c0_173 = arith.constant 0 : index
    %c0_174 = arith.constant 0 : index
    %319 = vector.load %arg9[%c5_172, %c0_173, %c0_174] : memref<8x1x1xf32, #tpu.memory_space<vmem>>, vector<1x1x1xf32>
    %320 = vector.shape_cast %319 : vector<1x1x1xf32> to vector<1x1xf32>
    %321 = vector.broadcast %320 : vector<1x1xf32> to vector<1x256xf32>
    %322 = arith.addf %318, %321 : vector<1x256xf32>
    %c5_175 = arith.constant 5 : index
    %c0_176 = arith.constant 0 : index
    %323 = vector.load %arg10[%c5_175, %c0_176] : memref<8x256xf32, #tpu.memory_space<vmem>>, vector<1x256xf32>
    tpu.vector_store %arg10[%c5_175, %c0_176], %322 {strides = array<i32>} : memref<8x256xf32, #tpu.memory_space<vmem>>, vector<1x256xf32>,
    %c6 = arith.constant 6 : index
    %c0_177 = arith.constant 0 : index
    %c0_178 = arith.constant 0 : index
    %324 = vector.load %arg3[%c6, %c0_177, %c0_178] : memref<8x8x256xf32, #tpu.memory_space<vmem>>, vector<1x8x256xf32>
    %325 = vector.shape_cast %324 : vector<1x8x256xf32> to vector<8x256xf32>
    %c6_179 = arith.constant 6 : index
    %c0_180 = arith.constant 0 : index
    %c0_181 = arith.constant 0 : index
    %326 = vector.load %arg4[%c6_179, %c0_180, %c0_181] : memref<8x8x10xf32, #tpu.memory_space<vmem>>, vector<1x8x10xf32>
    %327 = vector.shape_cast %326 : vector<1x8x10xf32> to vector<8x10xf32>
    %328 = vector.extract_strided_slice %327 {offsets = [0, 2], sizes = [8, 8], strides = [1, 1]} : vector<8x10xf32> to vector<8x8xf32>
    %cst_182 = arith.constant dense<0.000000e+00> : vector<8x256xf32>
    %329 = tpu.matmul %328, %325, %cst_182 {dimension_numbers = #tpu.dot_dimension_numbers<[1], [0], [0], [1], [0, 0, 1, 1], [], []>} : vector<8x8xf32>, vector<8x256xf32>, vector<8x256xf32> -> vector<8x256xf32>
    %330 = vector.extract_strided_slice %327 {offsets = [0, 0], sizes = [8, 1], strides = [1, 1]} : vector<8x10xf32> to vector<8x1xf32>
    %331 = vector.extract_strided_slice %9 {offsets = [6, 0], sizes = [1, 256], strides = [1, 1]} : vector<8x256xf32> to vector<1x256xf32>
    %332 = vector.broadcast %330 : vector<8x1xf32> to vector<8x256xf32>
    %333 = vector.broadcast %331 : vector<1x256xf32> to vector<8x256xf32>
    %334 = arith.mulf %332, %333 : vector<8x256xf32>
    %335 = arith.addf %329, %334 : vector<8x256xf32>
    %336 = vector.extract_strided_slice %327 {offsets = [0, 1], sizes = [8, 1], strides = [1, 1]} : vector<8x10xf32> to vector<8x1xf32>
    %337 = vector.extract_strided_slice %17 {offsets = [6, 0], sizes = [1, 256], strides = [1, 1]} : vector<8x256xf32> to vector<1x256xf32>
    %338 = vector.broadcast %336 : vector<8x1xf32> to vector<8x256xf32>
    %339 = vector.broadcast %337 : vector<1x256xf32> to vector<8x256xf32>
    %340 = arith.mulf %338, %339 : vector<8x256xf32>
    %341 = arith.addf %335, %340 : vector<8x256xf32>
    %c6_183 = arith.constant 6 : index
    %c0_184 = arith.constant 0 : index
    %c0_185 = arith.constant 0 : index
    %342 = vector.load %arg5[%c6_183, %c0_184, %c0_185] : memref<8x8x1xf32, #tpu.memory_space<vmem>>, vector<1x8x1xf32>
    %343 = vector.shape_cast %342 : vector<1x8x1xf32> to vector<8x1xf32>
    %344 = vector.broadcast %343 : vector<8x1xf32> to vector<8x256xf32>
    %345 = arith.addf %341, %344 : vector<8x256xf32>
    %cst_186 = arith.constant 0.000000e+00 : f32
    %346 = vector.broadcast %cst_186 : f32 to vector<8x256xf32>
    %347 = arith.subf %346, %345 : vector<8x256xf32>
    %348 = math.exp %347 : vector<8x256xf32>
    %cst_187 = arith.constant 1.000000e+00 : f32
    %349 = vector.broadcast %cst_187 : f32 to vector<8x256xf32>
    %350 = arith.addf %349, %348 : vector<8x256xf32>
    %351 = tpu.reciprocal %350 {approx = true} : vector<8x256xf32> -> vector<8x256xf32>
    %352 = arith.mulf %345, %351 : vector<8x256xf32>
    %c6_188 = arith.constant 6 : index
    %c0_189 = arith.constant 0 : index
    %c0_190 = arith.constant 0 : index
    %353 = vector.load %arg6[%c6_188, %c0_189, %c0_190] : memref<8x8x8xf32, #tpu.memory_space<vmem>>, vector<1x8x8xf32>
    %354 = vector.shape_cast %353 : vector<1x8x8xf32> to vector<8x8xf32>
    %cst_191 = arith.constant dense<0.000000e+00> : vector<8x256xf32>
    %355 = tpu.matmul %354, %352, %cst_191 {dimension_numbers = #tpu.dot_dimension_numbers<[1], [0], [0], [1], [0, 0, 1, 1], [], []>} : vector<8x8xf32>, vector<8x256xf32>, vector<8x256xf32> -> vector<8x256xf32>
    %c6_192 = arith.constant 6 : index
    %c0_193 = arith.constant 0 : index
    %c0_194 = arith.constant 0 : index
    %356 = vector.load %arg7[%c6_192, %c0_193, %c0_194] : memref<8x8x1xf32, #tpu.memory_space<vmem>>, vector<1x8x1xf32>
    %357 = vector.shape_cast %356 : vector<1x8x1xf32> to vector<8x1xf32>
    %358 = vector.broadcast %357 : vector<8x1xf32> to vector<8x256xf32>
    %359 = arith.addf %355, %358 : vector<8x256xf32>
    %cst_195 = arith.constant 0.000000e+00 : f32
    %360 = vector.broadcast %cst_195 : f32 to vector<8x256xf32>
    %361 = arith.subf %360, %359 : vector<8x256xf32>
    %362 = math.exp %361 : vector<8x256xf32>
    %cst_196 = arith.constant 1.000000e+00 : f32
    %363 = vector.broadcast %cst_196 : f32 to vector<8x256xf32>
    %364 = arith.addf %363, %362 : vector<8x256xf32>
    %365 = tpu.reciprocal %364 {approx = true} : vector<8x256xf32> -> vector<8x256xf32>
    %366 = arith.mulf %359, %365 : vector<8x256xf32>
    %c6_197 = arith.constant 6 : index
    %c0_198 = arith.constant 0 : index
    %c0_199 = arith.constant 0 : index
    %367 = vector.load %arg8[%c6_197, %c0_198, %c0_199] : memref<8x1x8xf32, #tpu.memory_space<vmem>>, vector<1x1x8xf32>
    %368 = vector.shape_cast %367 : vector<1x1x8xf32> to vector<1x8xf32>
    %cst_200 = arith.constant dense<0.000000e+00> : vector<1x256xf32>
    %369 = tpu.matmul %368, %366, %cst_200 {dimension_numbers = #tpu.dot_dimension_numbers<[1], [0], [0], [1], [0, 0, 1, 1], [], []>} : vector<1x8xf32>, vector<8x256xf32>, vector<1x256xf32> -> vector<1x256xf32>
    %c6_201 = arith.constant 6 : index
    %c0_202 = arith.constant 0 : index
    %c0_203 = arith.constant 0 : index
    %370 = vector.load %arg9[%c6_201, %c0_202, %c0_203] : memref<8x1x1xf32, #tpu.memory_space<vmem>>, vector<1x1x1xf32>
    %371 = vector.shape_cast %370 : vector<1x1x1xf32> to vector<1x1xf32>
    %372 = vector.broadcast %371 : vector<1x1xf32> to vector<1x256xf32>
    %373 = arith.addf %369, %372 : vector<1x256xf32>
    %c6_204 = arith.constant 6 : index
    %c0_205 = arith.constant 0 : index
    %374 = vector.load %arg10[%c6_204, %c0_205] : memref<8x256xf32, #tpu.memory_space<vmem>>, vector<1x256xf32>
    tpu.vector_store %arg10[%c6_204, %c0_205], %373 {strides = array<i32>} : memref<8x256xf32, #tpu.memory_space<vmem>>, vector<1x256xf32>,
    %c7 = arith.constant 7 : index
    %c0_206 = arith.constant 0 : index
    %c0_207 = arith.constant 0 : index
    %375 = vector.load %arg3[%c7, %c0_206, %c0_207] : memref<8x8x256xf32, #tpu.memory_space<vmem>>, vector<1x8x256xf32>
    %376 = vector.shape_cast %375 : vector<1x8x256xf32> to vector<8x256xf32>
    %c7_208 = arith.constant 7 : index
    %c0_209 = arith.constant 0 : index
    %c0_210 = arith.constant 0 : index
    %377 = vector.load %arg4[%c7_208, %c0_209, %c0_210] : memref<8x8x10xf32, #tpu.memory_space<vmem>>, vector<1x8x10xf32>
    %378 = vector.shape_cast %377 : vector<1x8x10xf32> to vector<8x10xf32>
    %379 = vector.extract_strided_slice %378 {offsets = [0, 2], sizes = [8, 8], strides = [1, 1]} : vector<8x10xf32> to vector<8x8xf32>
    %cst_211 = arith.constant dense<0.000000e+00> : vector<8x256xf32>
    %380 = tpu.matmul %379, %376, %cst_211 {dimension_numbers = #tpu.dot_dimension_numbers<[1], [0], [0], [1], [0, 0, 1, 1], [], []>} : vector<8x8xf32>, vector<8x256xf32>, vector<8x256xf32> -> vector<8x256xf32>
    %381 = vector.extract_strided_slice %378 {offsets = [0, 0], sizes = [8, 1], strides = [1, 1]} : vector<8x10xf32> to vector<8x1xf32>
    %382 = vector.extract_strided_slice %9 {offsets = [7, 0], sizes = [1, 256], strides = [1, 1]} : vector<8x256xf32> to vector<1x256xf32>
    %383 = vector.broadcast %381 : vector<8x1xf32> to vector<8x256xf32>
    %384 = vector.broadcast %382 : vector<1x256xf32> to vector<8x256xf32>
    %385 = arith.mulf %383, %384 : vector<8x256xf32>
    %386 = arith.addf %380, %385 : vector<8x256xf32>
    %387 = vector.extract_strided_slice %378 {offsets = [0, 1], sizes = [8, 1], strides = [1, 1]} : vector<8x10xf32> to vector<8x1xf32>
    %388 = vector.extract_strided_slice %17 {offsets = [7, 0], sizes = [1, 256], strides = [1, 1]} : vector<8x256xf32> to vector<1x256xf32>
    %389 = vector.broadcast %387 : vector<8x1xf32> to vector<8x256xf32>
    %390 = vector.broadcast %388 : vector<1x256xf32> to vector<8x256xf32>
    %391 = arith.mulf %389, %390 : vector<8x256xf32>
    %392 = arith.addf %386, %391 : vector<8x256xf32>
    %c7_212 = arith.constant 7 : index
    %c0_213 = arith.constant 0 : index
    %c0_214 = arith.constant 0 : index
    %393 = vector.load %arg5[%c7_212, %c0_213, %c0_214] : memref<8x8x1xf32, #tpu.memory_space<vmem>>, vector<1x8x1xf32>
    %394 = vector.shape_cast %393 : vector<1x8x1xf32> to vector<8x1xf32>
    %395 = vector.broadcast %394 : vector<8x1xf32> to vector<8x256xf32>
    %396 = arith.addf %392, %395 : vector<8x256xf32>
    %cst_215 = arith.constant 0.000000e+00 : f32
    %397 = vector.broadcast %cst_215 : f32 to vector<8x256xf32>
    %398 = arith.subf %397, %396 : vector<8x256xf32>
    %399 = math.exp %398 : vector<8x256xf32>
    %cst_216 = arith.constant 1.000000e+00 : f32
    %400 = vector.broadcast %cst_216 : f32 to vector<8x256xf32>
    %401 = arith.addf %400, %399 : vector<8x256xf32>
    %402 = tpu.reciprocal %401 {approx = true} : vector<8x256xf32> -> vector<8x256xf32>
    %403 = arith.mulf %396, %402 : vector<8x256xf32>
    %c7_217 = arith.constant 7 : index
    %c0_218 = arith.constant 0 : index
    %c0_219 = arith.constant 0 : index
    %404 = vector.load %arg6[%c7_217, %c0_218, %c0_219] : memref<8x8x8xf32, #tpu.memory_space<vmem>>, vector<1x8x8xf32>
    %405 = vector.shape_cast %404 : vector<1x8x8xf32> to vector<8x8xf32>
    %cst_220 = arith.constant dense<0.000000e+00> : vector<8x256xf32>
    %406 = tpu.matmul %405, %403, %cst_220 {dimension_numbers = #tpu.dot_dimension_numbers<[1], [0], [0], [1], [0, 0, 1, 1], [], []>} : vector<8x8xf32>, vector<8x256xf32>, vector<8x256xf32> -> vector<8x256xf32>
    %c7_221 = arith.constant 7 : index
    %c0_222 = arith.constant 0 : index
    %c0_223 = arith.constant 0 : index
    %407 = vector.load %arg7[%c7_221, %c0_222, %c0_223] : memref<8x8x1xf32, #tpu.memory_space<vmem>>, vector<1x8x1xf32>
    %408 = vector.shape_cast %407 : vector<1x8x1xf32> to vector<8x1xf32>
    %409 = vector.broadcast %408 : vector<8x1xf32> to vector<8x256xf32>
    %410 = arith.addf %406, %409 : vector<8x256xf32>
    %cst_224 = arith.constant 0.000000e+00 : f32
    %411 = vector.broadcast %cst_224 : f32 to vector<8x256xf32>
    %412 = arith.subf %411, %410 : vector<8x256xf32>
    %413 = math.exp %412 : vector<8x256xf32>
    %cst_225 = arith.constant 1.000000e+00 : f32
    %414 = vector.broadcast %cst_225 : f32 to vector<8x256xf32>
    %415 = arith.addf %414, %413 : vector<8x256xf32>
    %416 = tpu.reciprocal %415 {approx = true} : vector<8x256xf32> -> vector<8x256xf32>
    %417 = arith.mulf %410, %416 : vector<8x256xf32>
    %c7_226 = arith.constant 7 : index
    %c0_227 = arith.constant 0 : index
    %c0_228 = arith.constant 0 : index
    %418 = vector.load %arg8[%c7_226, %c0_227, %c0_228] : memref<8x1x8xf32, #tpu.memory_space<vmem>>, vector<1x1x8xf32>
    %419 = vector.shape_cast %418 : vector<1x1x8xf32> to vector<1x8xf32>
    %cst_229 = arith.constant dense<0.000000e+00> : vector<1x256xf32>
    %420 = tpu.matmul %419, %417, %cst_229 {dimension_numbers = #tpu.dot_dimension_numbers<[1], [0], [0], [1], [0, 0, 1, 1], [], []>} : vector<1x8xf32>, vector<8x256xf32>, vector<1x256xf32> -> vector<1x256xf32>
    %c7_230 = arith.constant 7 : index
    %c0_231 = arith.constant 0 : index
    %c0_232 = arith.constant 0 : index
    %421 = vector.load %arg9[%c7_230, %c0_231, %c0_232] : memref<8x1x1xf32, #tpu.memory_space<vmem>>, vector<1x1x1xf32>
    %422 = vector.shape_cast %421 : vector<1x1x1xf32> to vector<1x1xf32>
    %423 = vector.broadcast %422 : vector<1x1xf32> to vector<1x256xf32>
    %424 = arith.addf %420, %423 : vector<1x256xf32>
    %c7_233 = arith.constant 7 : index
    %c0_234 = arith.constant 0 : index
    %425 = vector.load %arg10[%c7_233, %c0_234] : memref<8x256xf32, #tpu.memory_space<vmem>>, vector<1x256xf32>
    tpu.vector_store %arg10[%c7_233, %c0_234], %424 {strides = array<i32>} : memref<8x256xf32, #tpu.memory_space<vmem>>, vector<1x256xf32>,
    return
  }
  func.func @transform_0(%arg0: i32) -> (i32, i32) {
    %c0_i32 = arith.constant 0 : i32
    %c0_i32_0 = arith.constant 0 : i32
    return %arg0, %c0_i32 : i32, i32
  }
  func.func @transform_1(%arg0: i32) -> (i32, i32) {
    %c0_i32 = arith.constant 0 : i32
    %c0_i32_0 = arith.constant 0 : i32
    %c0_i32_1 = arith.constant 0 : i32
    return %c0_i32, %c0_i32_0 : i32, i32
  }
  func.func @transform_2(%arg0: i32) -> (i32, i32, i32) {
    %c0_i32 = arith.constant 0 : i32
    %c0_i32_0 = arith.constant 0 : i32
    %c0_i32_1 = arith.constant 0 : i32
    return %arg0, %c0_i32, %c0_i32_0 : i32, i32, i32
  }
  func.func @transform_3(%arg0: i32) -> (i32, i32, i32) {
    %c0_i32 = arith.constant 0 : i32
    %c0_i32_0 = arith.constant 0 : i32
    %c0_i32_1 = arith.constant 0 : i32
    return %arg0, %c0_i32, %c0_i32_0 : i32, i32, i32
  }
  func.func @transform_4(%arg0: i32) -> (i32, i32, i32) {
    %c0_i32 = arith.constant 0 : i32
    %c0_i32_0 = arith.constant 0 : i32
    %c0_i32_1 = arith.constant 0 : i32
    return %arg0, %c0_i32, %c0_i32_0 : i32, i32, i32
  }
  func.func @transform_5(%arg0: i32) -> (i32, i32, i32) {
    %c0_i32 = arith.constant 0 : i32
    %c0_i32_0 = arith.constant 0 : i32
    %c0_i32_1 = arith.constant 0 : i32
    return %arg0, %c0_i32, %c0_i32_0 : i32, i32, i32
  }
  func.func @transform_6(%arg0: i32) -> (i32, i32, i32) {
    %c0_i32 = arith.constant 0 : i32
    %c0_i32_0 = arith.constant 0 : i32
    %c0_i32_1 = arith.constant 0 : i32
    return %arg0, %c0_i32, %c0_i32_0 : i32, i32, i32
  }
  func.func @transform_7(%arg0: i32) -> (i32, i32, i32) {
    %c0_i32 = arith.constant 0 : i32
    %c0_i32_0 = arith.constant 0 : i32
    %c0_i32_1 = arith.constant 0 : i32
    return %arg0, %c0_i32, %c0_i32_0 : i32, i32, i32
  }
  func.func @transform_8(%arg0: i32) -> (i32, i32, i32) {
    %c0_i32 = arith.constant 0 : i32
    %c0_i32_0 = arith.constant 0 : i32
    %c0_i32_1 = arith.constant 0 : i32
    return %arg0, %c0_i32, %c0_i32_0 : i32, i32, i32
  }
  func.func @transform_9(%arg0: i32) -> (i32, i32) {
    %c0_i32 = arith.constant 0 : i32
    %c0_i32_0 = arith.constant 0 : i32
    return %arg0, %c0_i32 : i32, i32
  }
}

</mosaic_0001>

<bundles_post_ra>
// kernel: tpu_custom_call.1
= control target key start
LH: loop header
LB: loop body
LE: loop exit
PB: predicated region body
PF: predicated region fallthrough
CT: control target
= control target key end

     0   :  { %14 = vsyncpa [#allocation3], 0  ;;  %s2641_s0 = inlined_call_operand.vmem [shape: f32[8,4], index: 0, kind: input, shape index: {}]   ;;  %s2642_s1 = inlined_call_operand.vmem [shape: f32[2,256], index: 1, kind: input, shape index: {}]   ;;  %s2643_s2 = inlined_call_operand.vmem [shape: f32[8,8,256], index: 2, kind: input, shape index: {}]   ;;  %s2644_s3 = inlined_call_operand.hbm [shape: f32[8,8,10], index: 3, kind: input, shape index: {}]   ;;  %s2645_s4 = inlined_call_operand.vmem [shape: f32[8,8,1], index: 4, kind: input, shape index: {}]   ;;  %s2646_s5 = inlined_call_operand.hbm [shape: f32[8,8,8], index: 5, kind: input, shape index: {}]   ;;  %s2647_s6 = inlined_call_operand.vmem [shape: f32[8,8,1], index: 6, kind: input, shape index: {}]   ;;  %s2648_s7 = inlined_call_operand.vmem [shape: f32[8,1,8], index: 7, kind: input, shape index: {}]   ;;  %s2649_s8 = inlined_call_operand.vmem [shape: f32[8,1,1], index: 8, kind: input, shape index: {}]   ;;  %s2650_s9 = inlined_call_operand.hbm [shape: f32[8,256], index: 9, kind: output, shape index: {}]  }
   0x1   :  { %15 = vsyncpa [#allocation6], 0 }
   0x2   :  { %16 = vsyncpa [#allocation4], 0  ;;  %s27_s11 = sshll.u32 %s2644_s3, 4  ;;  %s2149_s12 = smov [#allocation2]   ;;  %s28_s11 = int_to_ptr.hbm [resolvable:$true] %s27_s11 }
   0x3   :  { %s29_s13 = sshll.u32 %s2149_s12, 4  ;;  %s42_s16 = sshll.u32 %s2646_s5, 4  ;;  %s30_s13 = int_to_ptr.vmem [resolvable:$true] %s29_s13  ;;  %s43_s16 = int_to_ptr.hbm [resolvable:$true] %s42_s16 }
   0x4   :  { %s2150_s17 = smov 128   ;;  %s2151_s18 = smov 8  }
   0x5   :  { %35 = dma.hbm_to_vmem [thread:$0]  %s28_s11, 1024, %s30_s13, [#allocation3], %s2150_s17, %s2150_s17, %s2151_s18  }
   0x6   :  { %s2152_s19 = smov [#allocation5]  }
   0x7   :  { %s44_s20 = sshll.u32 %s2152_s19, 4  ;;  %s45_s20 = int_to_ptr.vmem [resolvable:$true] %s44_s20 }
   0x8   :  { %50 = dma.hbm_to_vmem [thread:$0]  %s43_s16, 1024, %s45_s20, [#allocation6], %s2150_s17, %s2150_s17, %s2151_s18  }
   0x9   :  { %2143 = dma.done.wait [#allocation3], 1024  }
   0xa   :  { %2144 = vsyncadd [#allocation3], 4294966272 }
   0xb   :  { %2145 = dma.done.wait [#allocation6], 1024  }
   0xc   :  { %2146 = vsyncadd [#allocation6], 4294966272  ;;  %v2153_v0 = vmov 2   ;;  %v2154_v1 = vmov 0   ;;  %v103_v2 = vld [vmem:[#allocation2] sm:$0xff]  ;;  %s2155_s21 = smov 126  }
   0xd   :  { %1929 = vset.pattern.permute.xlu1 %v2153_v0  ;;  %1928 = vset.pattern.permute.xlu0 %v2154_v1  ;;  %v66_v3 = vld [vmem:[%s2641_s0] sm:$0xff]  ;;  %v2156_v4 = vmov 1   ;;  %v317_v7 = vld [vmem:[#allocation2 + $0x8] sm:$0xff]  ;;  %v531_v9 = vld [vmem:[#allocation2 + $0x10] sm:$0xff]  ;;  %vm115_vm0 = vcmask 64512   ;;  %vm304_vm1 = vcmask 1040384  }
   0xe   :  { %1931 = vset.pattern.permute.xlu2 %v2154_v1  ;;  %113 = vrot.lane.b32.xlu0 %v103_v2, %s2155_s21  ;;  %v189_v5 = vld [vmem:[%s2647_s6] sm:$0xff]  ;;  %v1839_v8 = vld [vmem:[%s2645_s4 + $0x8] sm:$0xff]  ;;  %v745_v11 = vld [vmem:[#allocation2 + $0x18] sm:$0xff]  ;;  %s2157_s17 = smov [#allocation7]   ;;  %s1818_s3 = sshll.u32 %s2650_s9, 4  ;;  %s1819_s3 = int_to_ptr.hbm [resolvable:$true] %s1818_s3 }
   0xf   :  { %82 = vperm.xlu1 %1929, %v66_v3   ;;  %106 = vperm.xlu2 %1931, %v103_v2   ;;  %v168_v6 = vld [vmem:[%s2645_s4] sm:$0xff]  ;;  %v1840_v10 = vld [vmem:[%s2647_s6 + $0x8] sm:$0xff]  ;;  %v1851_v12 = vld [vmem:[%s2645_s4 + $0x10] sm:$0xff]  ;;  %s1816_s18 = sshll.u32 %s2157_s17, 4  ;;  %s1817_s18 = int_to_ptr.vmem [resolvable:$true] %s1816_s18 }
  0x10   :  { %v1852_v13 = vld [vmem:[%s2647_s6 + $0x10] sm:$0xff]  ;;  %v959_v14 = vld [vmem:[#allocation2 + $0x20] sm:$0xff]  ;;  %v1863_v15 = vld [vmem:[%s2645_s4 + $0x18] sm:$0xff] }
  0x11   :  { %v1876_v16 = vld [vmem:[%s2647_s6 + $0x20] sm:$0xff]  ;;  %v1864_v17 = vld [vmem:[%s2647_s6 + $0x18] sm:$0xff]  ;;  %v1888_v18 = vld [vmem:[%s2647_s6 + $0x28] sm:$0xff] }
  0x12   :  { %v1875_v19 = vld [vmem:[%s2645_s4 + $0x20] sm:$0xff]  ;;  %v1173_v20 = vld [vmem:[#allocation2 + $0x28] sm:$0xff]  ;;  %v1899_v21 = vld [vmem:[%s2645_s4 + $0x30] sm:$0xff] }
  0x13   :  { %v101_v22 = vld [vmem:[%s2643_s2] sm:$0xff]  ;;  %v102_v23 = vld [vmem:[%s2643_s2 + $0x8] sm:$0xff]  ;;  %v1601_v25 = vld [vmem:[#allocation2 + $0x38] sm:$0xff] }
  0x14   :  { %133 = vmatpush.msra.mxu0 %v101_v22  ;;  %153 = vmatpush.msra.mxu1 %v102_v23  ;;  %v1887_v24 = vld [vmem:[%s2645_s4 + $0x28] sm:$0xff]  ;;  %v1387_v26 = vld [vmem:[#allocation2 + $0x30] sm:$0xff]  ;;  %v65_v33 = vld [vmem:[%s2642_s1] sm:$0xf] }
  0x15   :  { %v73_v35 = vperm.slane %v65_v33, 0  ;;  %v74_v36 = vperm.slane %v65_v33, 2 }
  0x16   :  { %69 = vperm.xlu0 %1928, %v66_v3  }
  0x17   :  { %1930 = vset.pattern.permute.xlu1 %v2156_v4  ;;  %1932 = vset.pattern.permute.xlu2 %v2156_v4  ;;  %v77_v38 = vperm.slane %v73_v35, 0  ;;  %v78_v39 = vperm.slane %v74_v36, 0 }
  0x18   :  { %88 = vperm.xlu1 %1930, %v66_v3   ;;  %159 = vperm.xlu2 %1932, %v103_v2  }
  0x1e   :  { %192 = vperm.xlu0 %1928, %v189_v5  }
  0x20   :  { %1933 = vset.pattern.permute.xlu1 %v2154_v1  ;;  %327 = vrot.lane.b32.xlu2 %v317_v7, %s2155_s21 }
  0x21   :  { %171 = vperm.xlu1 %1933, %v168_v6  }
  0x26   :  { %385 = vperm.xlu0 %1928, %v1839_v8  }
  0x28   :  { %372 = vperm.xlu2 %1932, %v317_v7  }
  0x29   :  { %320 = vperm.xlu1 %1933, %v317_v7  }
  0x2e   :  { %534 = vperm.xlu0 %1928, %v531_v9  }
  0x30   :  { %1934 = vset.pattern.permute.xlu2 %v2154_v1 }
  0x31   :  { %541 = vrot.lane.b32.xlu1 %v531_v9, %s2155_s21  ;;  %408 = vperm.xlu2 %1934, %v1840_v10  }
  0x32   :  { %1935 = vset.pattern.permute.xlu1 %v2156_v4 }
  0x36   :  { %755 = vrot.lane.b32.xlu0 %v745_v11, %s2155_s21 }
  0x37   :  { %1937 = vset.pattern.permute.xlu0 %v2156_v4 }
  0x39   :  { %586 = vperm.xlu1 %1935, %v531_v9   ;;  %599 = vperm.xlu2 %1934, %v1851_v12   ;;  %v91_v12 = vperm.slane %v65_v33, 1 }
  0x3e   :  { %800 = vperm.xlu0 %1937, %v745_v11  }
  0x41   :  { %1936 = vset.pattern.permute.xlu1 %v2154_v1  ;;  %748 = vperm.xlu2 %1934, %v745_v11  }
  0x42   :  { %622 = vperm.xlu1 %1936, %v1852_v13   ;;  %v92_v13 = vperm.slane %v65_v33, 3 }
  0x46   :  { %1014 = vperm.xlu0 %1937, %v959_v14  }
  0x49   :  { %969 = vrot.lane.b32.xlu2 %v959_v14, %s2155_s21 }
  0x4a   :  { %813 = vperm.xlu1 %1936, %v1863_v15   ;;  %v96_v15 = vperm.slane %v92_v13, 1 }
  0x4e   :  { %1938 = vset.pattern.permute.xlu0 %v2154_v1 }
  0x4f   :  { %1050 = vperm.xlu0 %1938, %v1876_v16  }
  0x51   :  { %962 = vperm.xlu2 %1934, %v959_v14   ;;  %v95_v14 = vperm.slane %v91_v12, 1 }
  0x52   :  { %836 = vperm.xlu1 %1936, %v1864_v17  }
  0x57   :  { %1264 = vperm.xlu0 %1938, %v1888_v18  }
  0x59   :  { %1183 = vrot.lane.b32.xlu2 %v1173_v20, %s2155_s21 }
  0x5a   :  { %1027 = vperm.xlu1 %1936, %v1875_v19   ;;  %1939 = vset.pattern.permute.xlu2 %v2156_v4 }
  0x5f   :  { %1455 = vperm.xlu0 %1938, %v1899_v21  }
  0x61   :  { %1228 = vperm.xlu2 %1939, %v1173_v20  }
  0x62   :  { %1176 = vperm.xlu1 %1936, %v1173_v20  }
  0x67   :  { %1604 = vperm.xlu0 %1938, %v1601_v25  }
  0x69   :  { %1397 = vrot.lane.b32.xlu2 %v1387_v26, %s2155_s21  ;;  %v2280_v27 = vpop.permute.xlu2 %106 }
  0x6a   :  { %1241 = vperm.xlu1 %1936, %v1887_v24  }
  0x71   :  { %1442 = vperm.xlu2 %1939, %v1387_v26  }
  0x72   :  { %1390 = vperm.xlu1 %1936, %v1387_v26   ;;  %v2282_v28 = vpop.permute.xlu2 %159 }
  0x79   :  { %1940 = vset.pattern.permute.xlu2 %v2154_v1 }
  0x7a   :  { %1611 = vrot.lane.b32.xlu1 %v1601_v25, %s2155_s21  ;;  %v2287_v29 = vpop.permute.xlu2 %327 }
  0x7b   :  { %1941 = vset.pattern.permute.xlu1 %v2156_v4 }
  0x80   :  { %v114_v30 = vpop.permute.xlu0 %113 }
  0x81   :  { %v83_v31 = vpop.permute.xlu1 %82  ;;  %1829 = vmatmul.msk.f32.vlgmr.msra.gmra.mxu0 %vm115_vm0, %v114_v30  ;;  %1830 = vmatmul.msk.f32.vlgmr.msra.gmra.mxu1 %vm115_vm0, %v114_v30 }
  0x82   :  { %1656 = vperm.xlu1 %1941, %v1601_v25   ;;  %v2291_v32 = vpop.permute.xlu2 %372 }
  0x88   :  { %v70_v41 = vpop.permute.xlu0 %69 }
  0x89   :  { %v79_v42 = vsub.f32 %v70_v41, %v77_v38  ;;  %v80_v43 = vsub.f32 %v70_v41, %v78_v39 }
  0x8a   :  { %v89_v34 = vpop.permute.xlu1 %88  ;;  %1942 = vset.pattern.permute.xlu1 %v2154_v1 }
  0x8b   :  { %v2297_v37 = vpop.permute.xlu2 %408  ;;  %v2301_v45 = vmul.f32 %v83_v31, %v79_v42  ;;  %v2303_v46 = vmul.f32 %v83_v31, %v80_v43  ;;  %v97_v16 = vsub.f32 %v89_v34, %v95_v14  ;;  %v98_v17 = vsub.f32 %v89_v34, %v96_v15 }
  0x8d   :  { %v751_v48 = vperm.slane %v2301_v45, 3  ;;  %v752_v49 = vperm.slane %v2303_v46, 3  ;;  %v965_v56 = vperm.slane %v2301_v45, 4  ;;  %v966_v57 = vperm.slane %v2303_v46, 4 }
  0x8e   :  { %v1179_v1 = vperm.slane %v2301_v45, 5  ;;  %v1180_v2 = vperm.slane %v2303_v46, 5  ;;  %v1393_v7 = vperm.slane %v2301_v45, 6  ;;  %v1394_v8 = vperm.slane %v2303_v46, 6 }
  0x8f   :  { %v2347_v18 = vmul.f32 %v97_v16, %v83_v31  ;;  %v2349_v19 = vmul.f32 %v98_v17, %v83_v31  ;;  %v109_v20 = vperm.slane %v2301_v45, 0  ;;  %v110_v21 = vperm.slane %v2303_v46, 0 }
  0x90   :  { %v323_v16 = vperm.slane %v2301_v45, 1 }
  0x91   :  { %v162_v22 = vperm.slane %v2347_v18, 0  ;;  %v163_v23 = vperm.slane %v2349_v19, 0  ;;  %v111_v24 = vmul.f32 %v109_v20, %v2280_v27  ;;  %v112_v25 = vmul.f32 %v110_v21, %v2280_v27 }
  0x92   :  { %v324_v20 = vperm.slane %v2303_v46, 1  ;;  %v375_v21 = vperm.slane %v2347_v18, 1 }
  0x93   :  { %v172_v40 = vpop.permute.xlu1 %171  ;;  %v2299_v44 = vpop.permute.xlu2 %599  ;;  %v164_v33 = vmul.f32 %v162_v22, %v2282_v28  ;;  %v165_v34 = vmul.f32 %v163_v23, %v2282_v28  ;;  %v376_v23 = vperm.slane %v2349_v19, 1 }
  0x9b   :  { %v2305_v47 = vpop.permute.xlu1 %320  ;;  %v749_v50 = vpop.permute.xlu2 %748 }
  0x9c   :  { %v2309_v51 = vmul.f32 %v751_v48, %v749_v50  ;;  %v2311_v52 = vmul.f32 %v752_v49, %v749_v50 }
  0xa3   :  { %v2313_v53 = vpop.permute.xlu1 %541  ;;  %v2315_v54 = vpop.permute.xlu2 %969 }
  0xab   :  { %v2317_v55 = vpop.permute.xlu1 %586  ;;  %v963_v58 = vpop.permute.xlu2 %962 }
  0xac   :  { %v2321_v59 = vmul.f32 %v965_v56, %v963_v58  ;;  %v2323_v60 = vmul.f32 %v966_v57, %v963_v58 }
  0xb4   :  { %v2325_v61 = vpop.permute.xlu1 %622 }
  0xbc   :  { %v2327_v62 = vpop.permute.xlu1 %813 }
  0xc4   :  { %v2329_v63 = vpop.permute.xlu1 %836 }
  0xcc   :  { %v2331_v0 = vpop.permute.xlu1 %1027 }
  0xd4   :  { %v1177_v3 = vpop.permute.xlu1 %1176 }
  0xd5   :  { %v2335_v4 = vmul.f32 %v1179_v1, %v1177_v3  ;;  %v2337_v5 = vmul.f32 %v1180_v2, %v1177_v3  ;;  %v188_v2 = vld [vmem:[#allocation5] sm:$0xff] }
  0xdc   :  { %v2339_v6 = vpop.permute.xlu1 %1241 }
  0xe4   :  { %v1391_v9 = vpop.permute.xlu1 %1390 }
  0xe5   :  { %v2343_v10 = vmul.f32 %v1393_v7, %v1391_v9  ;;  %v2345_v11 = vmul.f32 %v1394_v8, %v1391_v9  ;;  %v1836_v7 = vld [vmem:[%s2643_s2 + $0x18] sm:$0xff]  ;;  %v193_v8 = vpop.permute.xlu0 %192 }
  0xfe   :  { %v135_v26 = vpop.f32.mrf.mxu0  ;;  %v155_v30 = vpop.f32.mrf.mxu1 }
  0xff   :  { %v136_v31 = vadd.f32 %v135_v26, %v111_v24  ;;  %v156_v35 = vadd.f32 %v155_v30, %v112_v25  ;;  %v251_v25 = vld [vmem:[%s2649_s8] sm:$0x1]  ;;  %v326_v30 = vmul.f32 %v324_v20, %v2305_v47  ;;  %v1848_v20 = vld [vmem:[%s2643_s2 + $0x28] sm:$0xff] }
 0x100   :  { %254 = vperm.xlu1 %1942, %v251_v25  }
 0x101   :  { %v166_v36 = vadd.f32 %v164_v33, %v136_v31  ;;  %v167_v38 = vadd.f32 %v165_v34, %v156_v35  ;;  %v377_v33 = vmul.f32 %v375_v21, %v2291_v32  ;;  %v378_v35 = vmul.f32 %v376_v23, %v2291_v32  ;;  %v2399_v21 = vpop.permute.xlu1 %1611 }
 0x103   :  { %v174_v39 = vadd.f32 %v172_v40, %v166_v36  ;;  %v175_v41 = vadd.f32 %v172_v40, %v167_v38  ;;  %v1835_v40 = vld [vmem:[%s2643_s2 + $0x10] sm:$0xff] }
 0x105   :  { %v176_v42 = vsub.f32 0.0, %v174_v39  ;;  %v177_v43 = vsub.f32 0.0, %v175_v41 }
 0x107   :  { %v178_v48 = vmul.f32 1.442695, %v176_v42  ;;  %v180_v49 = vmul.f32 1.442695, %v177_v43 }
 0x109   :  { %1943 = vpow2.f32 %v178_v48 }
 0x10a   :  { %1945 = vpow2.f32 %v180_v49 }
 0x10f   :  { %v1944_v50 = vpop.eup %1943 }
 0x110   :  { %v1946_v27 = vpop.eup %1945  ;;  %v182_v56 = vadd.f32 1.0, %v1944_v50 }
 0x111   :  { %v183_v57 = vadd.f32 1.0, %v1946_v27 }
 0x112   :  { %1947 = vrcp.f32 %v182_v56 }
 0x113   :  { %1949 = vrcp.f32 %v183_v57 }
 0x118   :  { %v1948_v58 = vpop.eup %1947 }
 0x119   :  { %v1950_v28 = vpop.eup %1949  ;;  %v186_v1 = vmul.f32 %v1948_v58, %v174_v39  ;;  %v386_v39 = vpop.permute.xlu0 %385 }
 0x11a   :  { %v187_v3 = vmul.f32 %v1950_v28, %v175_v41 }
 0x11b   :  { %213 = vmatpush.msra.mxu2 %v186_v1 }
 0x11c   :  { %233 = vmatpush.msra.mxu3 %v187_v3  ;;  %1831 = vmatmul.msk.f32.vlgmr.msra.gmra.mxu2 %vm115_vm0, %v188_v2 }
 0x11d   :  { %1832 = vmatmul.msk.f32.vlgmr.msra.gmra.mxu3 %vm115_vm0, %v188_v2  ;;  %346 = vmatpush.msrb.mxu2 %v1835_v40  ;;  %v250_v2 = vld [vmem:[%s2648_s7] sm:$0x1] }
 0x11e   :  { %366 = vmatpush.msrb.mxu3 %v1836_v7 }
 0x124   :  { %1837 = vmatmul.msk.f32.vlgmr.msrb.gmra.mxu2 %vm115_vm0, %v2287_v29 }
 0x125   :  { %1838 = vmatmul.msk.f32.vlgmr.msrb.gmra.mxu3 %vm115_vm0, %v2287_v29  ;;  %v325_v29 = vmul.f32 %v323_v16, %v2305_v47  ;;  %v403_v16 = vld [vmem:[#allocation5 + $0x8] sm:$0xff] }
 0x19f   :  { %v215_v9 = vpop.f32.mrf.mxu2 }
 0x1a0   :  { %v216_v12 = vadd.f32 %v215_v9, %v193_v8  ;;  %v235_v13 = vpop.f32.mrf.mxu3 }
 0x1a1   :  { %v236_v14 = vadd.f32 %v235_v13, %v193_v8 }
 0x1a2   :  { %v238_v15 = vsub.f32 0.0, %v216_v12 }
 0x1a3   :  { %v239_v17 = vsub.f32 0.0, %v236_v14 }
 0x1a4   :  { %v240_v22 = vmul.f32 1.442695, %v238_v15 }
 0x1a5   :  { %v242_v24 = vmul.f32 1.442695, %v239_v17 }
 0x1a6   :  { %1951 = vpow2.f32 %v240_v22  ;;  %v2401_v22 = vpop.permute.xlu1 %1656 }
 0x1a7   :  { %1953 = vpow2.f32 %v242_v24  ;;  %v348_v26 = vpop.f32.mrf.mxu2 }
 0x1a8   :  { %v349_v34 = vadd.f32 %v348_v26, %v325_v29  ;;  %v368_v31 = vpop.f32.mrf.mxu3  ;;  %v307_v29 = vlaneseq }
 0x1a9   :  { %v369_v36 = vadd.f32 %v368_v31, %v326_v30 }
 0x1aa   :  { %v379_v38 = vadd.f32 %v377_v33, %v349_v34  ;;  %vm2403_vm2 = vcmp.lt.s32.totalorder %v307_v29, 256 }
 0x1ab   :  { %v380_v41 = vadd.f32 %v378_v35, %v369_v36 }
 0x1ac   :  { %v1952_v42 = vpop.eup %1951  ;;  %v388_v43 = vadd.f32 %v386_v39, %v379_v38 }
 0x1ad   :  { %v1954_v48 = vpop.eup %1953  ;;  %v244_v49 = vadd.f32 1.0, %v1952_v42  ;;  %v389_v50 = vadd.f32 %v386_v39, %v380_v41  ;;  %v537_v41 = vperm.slane %v2301_v45, 2 }
 0x1ae   :  { %v245_v27 = vadd.f32 1.0, %v1954_v48  ;;  %v390_v56 = vsub.f32 0.0, %v388_v43  ;;  %v255_v23 = vpop.permute.xlu1 %254 }
 0x1af   :  { %1955 = vrcp.f32 %v244_v49  ;;  %v391_v47 = vsub.f32 0.0, %v389_v50  ;;  %v257_v24 = vperm.slane %v255_v23, 0  ;;  %v589_v49 = vperm.slane %v2347_v18, 2 }
 0x1b0   :  { %1957 = vrcp.f32 %v245_v27  ;;  %v392_v57 = vmul.f32 1.442695, %v390_v56  ;;  %v590_v27 = vperm.slane %v2349_v19, 2  ;;  %v535_v56 = vpop.permute.xlu0 %534 }
 0x1b1   :  { %v394_v58 = vmul.f32 1.442695, %v391_v47 }
 0x1b2   :  { %1959 = vpow2.f32 %v392_v57  ;;  %v539_v57 = vmul.f32 %v537_v41, %v535_v56 }
 0x1b3   :  { %1961 = vpow2.f32 %v394_v58 }
 0x1b5   :  { %v1956_v28 = vpop.eup %1955 }
 0x1b6   :  { %v1958_v32 = vpop.eup %1957  ;;  %v248_v1 = vmul.f32 %v1956_v28, %v216_v12 }
 0x1b7   :  { %v249_v3 = vmul.f32 %v1958_v32, %v236_v14  ;;  %v1847_v14 = vld [vmem:[%s2643_s2 + $0x20] sm:$0xff] }
 0x1b8   :  { %v1960_v40 = vpop.eup %1959  ;;  %276 = vmatpush.msrb.mxu0 %v248_v1 }
 0x1b9   :  { %v1962_v7 = vpop.eup %1961  ;;  %v396_v8 = vadd.f32 1.0, %v1960_v40  ;;  %296 = vmatpush.msrb.mxu1 %v249_v3  ;;  %1833 = vmatmul.msk.f32.vlgmr.msrb.gmra.mxu0 %vm115_vm0, %v250_v2 }
 0x1ba   :  { %v397_v9 = vadd.f32 1.0, %v1962_v7  ;;  %1834 = vmatmul.msk.f32.vlgmr.msrb.gmra.mxu1 %vm115_vm0, %v250_v2  ;;  %v592_v2 = vmul.f32 %v590_v27, %v2317_v55  ;;  %v2444_v27 = vpop.permute.xlu2 %1183 }
 0x1bb   :  { %1963 = vrcp.f32 %v396_v8 }
 0x1bc   :  { %1965 = vrcp.f32 %v397_v9 }
 0x1c1   :  { %v1964_v13 = vpop.eup %1963 }
 0x1c2   :  { %v1966_v15 = vpop.eup %1965  ;;  %v400_v12 = vmul.f32 %v1964_v13, %v388_v43  ;;  %v538_v43 = vperm.slane %v2303_v46, 2 }
 0x1c3   :  { %v401_v17 = vmul.f32 %v1966_v15, %v389_v50 }
 0x1c4   :  { %429 = vmatpush.msra.mxu0 %v400_v12  ;;  %v540_v58 = vmul.f32 %v538_v43, %v535_v56  ;;  %v2446_v56 = vpop.permute.xlu2 %1228 }
 0x1c5   :  { %449 = vmatpush.msra.mxu1 %v401_v17  ;;  %1841 = vmatmul.msk.f32.vlgmr.msra.gmra.mxu0 %vm115_vm0, %v403_v16 }
 0x1c6   :  { %1842 = vmatmul.msk.f32.vlgmr.msra.gmra.mxu1 %vm115_vm0, %v403_v16  ;;  %560 = vmatpush.msrb.mxu0 %v1847_v14  ;;  %v1900_v14 = vld [vmem:[%s2647_s6 + $0x30] sm:$0xff] }
 0x1c7   :  { %580 = vmatpush.msrb.mxu1 %v1848_v20  ;;  %1478 = vperm.xlu2 %1940, %v1900_v14  }
 0x1cd   :  { %1849 = vmatmul.msk.f32.vlgmr.msrb.gmra.mxu0 %vm115_vm0, %v2313_v53 }
 0x1ce   :  { %1850 = vmatmul.msk.f32.vlgmr.msrb.gmra.mxu1 %vm115_vm0, %v2313_v53 }
 0x236   :  { %v278_v25 = vpop.f32.mrf.mxu0 }
 0x237   :  { %v298_v26 = vpop.f32.mrf.mxu1  ;;  %v279_v30 = vadd.f32 %v278_v25, %v257_v24 }
 0x238   :  { %v299_v33 = vadd.f32 %v298_v26, %v257_v24  ;;  %v1911_v24 = vld [vmem:[%s2645_s4 + $0x38] sm:$0xff]  ;;  %v1843_v26 = vld [vmem:[%s2648_s7 + $0x1] sm:$0x1] }
 0x239   :  { %1669 = vperm.xlu2 %1940, %v1911_v24  }
 0x23a   :  { %v303_v34 = vrot.slane %v299_v33, 7 }
 0x23c   :  { %v305_v35 = vsel %vm304_vm1, %v279_v30, %v303_v34 }
 0x23d   :  { %311 = vst.msk [vmem:[#allocation7] ss:$8 sm:$0x3] %vm2403_vm2, %v305_v35 }
 0x242   :  { %v431_v53 = vpop.f32.mrf.mxu0 }
 0x243   :  { %v432_v36 = vadd.f32 %v431_v53, %v2297_v37  ;;  %v451_v38 = vpop.f32.mrf.mxu1 }
 0x244   :  { %v452_v39 = vadd.f32 %v451_v38, %v2297_v37  ;;  %v591_v37 = vmul.f32 %v589_v49, %v2317_v55  ;;  %v1860_v49 = vld [vmem:[%s2643_s2 + $0x38] sm:$0xff] }
 0x245   :  { %v454_v42 = vsub.f32 0.0, %v432_v36 }
 0x246   :  { %v455_v48 = vsub.f32 0.0, %v452_v39 }
 0x247   :  { %v456_v50 = vmul.f32 1.442695, %v454_v42  ;;  %v617_v42 = vld [vmem:[#allocation5 + $0x10] sm:$0xff] }
 0x248   :  { %v458_v47 = vmul.f32 1.442695, %v455_v48  ;;  %v1859_v48 = vld [vmem:[%s2643_s2 + $0x30] sm:$0xff] }
 0x249   :  { %1967 = vpow2.f32 %v456_v50  ;;  %v756_v50 = vpop.permute.xlu0 %755 }
 0x24a   :  { %1969 = vpow2.f32 %v458_v47  ;;  %v562_v28 = vpop.f32.mrf.mxu0  ;;  %v2448_v47 = vpop.permute.xlu2 %1397 }
 0x24b   :  { %v563_v32 = vadd.f32 %v562_v28, %v539_v57  ;;  %v582_v1 = vpop.f32.mrf.mxu1 }
 0x24c   :  { %v583_v3 = vadd.f32 %v582_v1, %v540_v58 }
 0x24d   :  { %v593_v40 = vadd.f32 %v591_v37, %v563_v32 }
 0x24e   :  { %v594_v7 = vadd.f32 %v592_v2, %v583_v3 }
 0x24f   :  { %v1968_v8 = vpop.eup %1967  ;;  %v602_v9 = vadd.f32 %v2299_v44, %v593_v40 }
 0x250   :  { %v1970_v13 = vpop.eup %1969  ;;  %v460_v15 = vadd.f32 1.0, %v1968_v8  ;;  %v603_v12 = vadd.f32 %v2299_v44, %v594_v7 }
 0x251   :  { %v461_v16 = vadd.f32 1.0, %v1970_v13  ;;  %v604_v17 = vsub.f32 0.0, %v602_v9 }
 0x252   :  { %1971 = vrcp.f32 %v460_v15  ;;  %v605_v20 = vsub.f32 0.0, %v603_v12  ;;  %v2450_v57 = vpop.permute.xlu2 %1442 }
 0x253   :  { %1973 = vrcp.f32 %v461_v16  ;;  %v606_v55 = vmul.f32 1.442695, %v604_v17 }
 0x254   :  { %v608_v23 = vmul.f32 1.442695, %v605_v20  ;;  %v803_v20 = vperm.slane %v2347_v18, 3 }
 0x255   :  { %1975 = vpow2.f32 %v606_v55 }
 0x256   :  { %1977 = vpow2.f32 %v608_v23  ;;  %v804_v23 = vperm.slane %v2349_v19, 3 }
 0x258   :  { %v1972_v29 = vpop.eup %1971 }
 0x259   :  { %v1974_v44 = vpop.eup %1973  ;;  %v464_v25 = vmul.f32 %v1972_v29, %v432_v36  ;;  %v1844_v36 = vld [vmem:[%s2649_s8 + $0x1] sm:$0x1]  ;;  %v1856_v29 = vld [vmem:[%s2649_s8 + $0x2] sm:$0x1] }
 0x25a   :  { %v465_v30 = vmul.f32 %v1974_v44, %v452_v39  ;;  %472 = vperm.xlu2 %1940, %v1844_v36   ;;  %v2452_v58 = vpop.permute.xlu2 %1478  ;;  %v801_v44 = vpop.permute.xlu0 %800 }
 0x25b   :  { %v1976_v33 = vpop.eup %1975  ;;  %494 = vmatpush.msra.mxu2 %v464_v25 }
 0x25c   :  { %v1978_v34 = vpop.eup %1977  ;;  %v610_v35 = vadd.f32 1.0, %v1976_v33  ;;  %514 = vmatpush.msra.mxu3 %v465_v30  ;;  %1845 = vmatmul.msk.f32.vlgmr.msra.gmra.mxu2 %vm115_vm0, %v1843_v26  ;;  %v806_v33 = vmul.f32 %v804_v23, %v801_v44 }
 0x25d   :  { %v611_v53 = vadd.f32 1.0, %v1978_v34  ;;  %1846 = vmatmul.msk.f32.vlgmr.msra.gmra.mxu3 %vm115_vm0, %v1843_v26  ;;  %v805_v26 = vmul.f32 %v803_v20, %v801_v44 }
 0x25e   :  { %1979 = vrcp.f32 %v610_v35 }
 0x25f   :  { %1981 = vrcp.f32 %v611_v53 }
 0x264   :  { %v1980_v38 = vpop.eup %1979 }
 0x265   :  { %v1982_v39 = vpop.eup %1981  ;;  %v614_v41 = vmul.f32 %v1980_v38, %v602_v9  ;;  %v1912_v9 = vld [vmem:[%s2647_s6 + $0x38] sm:$0xff] }
 0x266   :  { %v615_v43 = vmul.f32 %v1982_v39, %v603_v12  ;;  %1692 = vperm.xlu0 %1938, %v1912_v9  }
 0x267   :  { %643 = vmatpush.msrb.mxu2 %v614_v41 }
 0x268   :  { %663 = vmatpush.msrb.mxu3 %v615_v43  ;;  %1853 = vmatmul.msk.f32.vlgmr.msrb.gmra.mxu2 %vm115_vm0, %v617_v42 }
 0x269   :  { %1854 = vmatmul.msk.f32.vlgmr.msrb.gmra.mxu3 %vm115_vm0, %v617_v42  ;;  %774 = vmatpush.msra.mxu2 %v1859_v48 }
 0x26a   :  { %794 = vmatpush.msra.mxu3 %v1860_v49 }
 0x26e   :  { %686 = vperm.xlu0 %1938, %v1856_v29  }
 0x270   :  { %1861 = vmatmul.msk.f32.vlgmr.msra.gmra.mxu2 %vm115_vm0, %v756_v50 }
 0x271   :  { %1862 = vmatmul.msk.f32.vlgmr.msra.gmra.mxu3 %vm115_vm0, %v756_v50 }
 0x293   :  { %v2454_v28 = vpop.permute.xlu2 %1669 }
 0x2b4   :  { %v473_v37 = vpop.permute.xlu2 %472 }
 0x2b5   :  { %v475_v32 = vperm.slane %v473_v37, 0 }
 0x2df   :  { %v496_v1 = vpop.f32.mrf.mxu2 }
 0x2e0   :  { %v516_v2 = vpop.f32.mrf.mxu3  ;;  %v497_v3 = vadd.f32 %v496_v1, %v475_v32  ;;  %v1855_v1 = vld [vmem:[%s2648_s7 + $0x2] sm:$0x1] }
 0x2e1   :  { %v517_v40 = vadd.f32 %v516_v2, %v475_v32 }
 0x2e3   :  { %v521_v7 = vrot.slane %v517_v40, 7 }
 0x2e5   :  { %v522_v8 = vsel %vm304_vm1, %v497_v3, %v521_v7 }
 0x2e6   :  { %525 = vst.msk [vmem:[#allocation7 + $0x1] ss:$8 sm:$0x3] %vm2403_vm2, %v522_v8 }
 0x2eb   :  { %v645_v13 = vpop.f32.mrf.mxu2 }
 0x2ec   :  { %v646_v15 = vadd.f32 %v645_v13, %v2325_v61  ;;  %v665_v12 = vpop.f32.mrf.mxu3 }
 0x2ed   :  { %v666_v16 = vadd.f32 %v665_v12, %v2325_v61 }
 0x2ee   :  { %v668_v17 = vsub.f32 0.0, %v646_v15 }
 0x2ef   :  { %v669_v14 = vsub.f32 0.0, %v666_v16 }
 0x2f0   :  { %v670_v55 = vmul.f32 1.442695, %v668_v17  ;;  %v1872_v17 = vld [vmem:[%s2643_s2 + $0x48] sm:$0xff] }
 0x2f1   :  { %v672_v24 = vmul.f32 1.442695, %v669_v14  ;;  %v1015_v14 = vpop.permute.xlu0 %1014 }
 0x2f2   :  { %1983 = vpow2.f32 %v670_v55 }
 0x2f3   :  { %1985 = vpow2.f32 %v672_v24  ;;  %v776_v25 = vpop.f32.mrf.mxu2 }
 0x2f4   :  { %v777_v61 = vadd.f32 %v776_v25, %v2309_v51  ;;  %v796_v30 = vpop.f32.mrf.mxu3 }
 0x2f5   :  { %v797_v34 = vadd.f32 %v796_v30, %v2311_v52 }
 0x2f6   :  { %v807_v35 = vadd.f32 %v805_v26, %v777_v61 }
 0x2f7   :  { %v808_v53 = vadd.f32 %v806_v33, %v797_v34 }
 0x2f8   :  { %v1984_v36 = vpop.eup %1983  ;;  %v816_v38 = vadd.f32 %v2327_v62, %v807_v35 }
 0x2f9   :  { %v1986_v39 = vpop.eup %1985  ;;  %v674_v41 = vadd.f32 1.0, %v1984_v36  ;;  %v817_v42 = vadd.f32 %v2327_v62, %v808_v53  ;;  %v2490_v20 = vpop.permute.xlu0 %1050 }
 0x2fa   :  { %v675_v43 = vadd.f32 1.0, %v1986_v39  ;;  %v818_v48 = vsub.f32 0.0, %v816_v38 }
 0x2fb   :  { %1987 = vrcp.f32 %v674_v41  ;;  %v819_v49 = vsub.f32 0.0, %v817_v42 }
 0x2fc   :  { %1989 = vrcp.f32 %v675_v43  ;;  %v820_v50 = vmul.f32 1.442695, %v818_v48  ;;  %v1018_v48 = vperm.slane %v2349_v19, 4 }
 0x2fd   :  { %v822_v51 = vmul.f32 1.442695, %v819_v49 }
 0x2fe   :  { %1991 = vpow2.f32 %v820_v50  ;;  %v1868_v50 = vld [vmem:[%s2649_s8 + $0x3] sm:$0x1] }
 0x2ff   :  { %1993 = vpow2.f32 %v822_v51  ;;  %900 = vperm.xlu1 %1942, %v1868_v50  }
 0x301   :  { %v1988_v37 = vpop.eup %1987  ;;  %v2492_v55 = vpop.permute.xlu0 %1264 }
 0x302   :  { %v1990_v52 = vpop.eup %1989  ;;  %v678_v32 = vmul.f32 %v1988_v37, %v646_v15  ;;  %v831_v15 = vld [vmem:[#allocation5 + $0x18] sm:$0xff] }
 0x303   :  { %v679_v2 = vmul.f32 %v1990_v52, %v666_v16  ;;  %v1871_v16 = vld [vmem:[%s2643_s2 + $0x40] sm:$0xff] }
 0x304   :  { %v1992_v3 = vpop.eup %1991  ;;  %708 = vmatpush.msra.mxu0 %v678_v32  ;;  %v1020_v32 = vmul.f32 %v1018_v48, %v1015_v14 }
 0x305   :  { %v1994_v62 = vpop.eup %1993  ;;  %v824_v40 = vadd.f32 1.0, %v1992_v3  ;;  %728 = vmatpush.msra.mxu1 %v679_v2  ;;  %1857 = vmatmul.msk.f32.vlgmr.msra.gmra.mxu0 %vm115_vm0, %v1855_v1 }
 0x306   :  { %v825_v7 = vadd.f32 1.0, %v1994_v62  ;;  %1858 = vmatmul.msk.f32.vlgmr.msra.gmra.mxu1 %vm115_vm0, %v1855_v1 }
 0x307   :  { %1995 = vrcp.f32 %v824_v40 }
 0x308   :  { %1997 = vrcp.f32 %v825_v7 }
 0x309   :  { %v2494_v23 = vpop.permute.xlu0 %1455 }
 0x30d   :  { %v1996_v8 = vpop.eup %1995 }
 0x30e   :  { %v1998_v9 = vpop.eup %1997  ;;  %v828_v13 = vmul.f32 %v1996_v8, %v816_v38 }
 0x30f   :  { %v829_v12 = vmul.f32 %v1998_v9, %v817_v42  ;;  %v1017_v42 = vperm.slane %v2347_v18, 4 }
 0x310   :  { %857 = vmatpush.msrb.mxu0 %v828_v13 }
 0x311   :  { %877 = vmatpush.msrb.mxu1 %v829_v12  ;;  %1865 = vmatmul.msk.f32.vlgmr.msrb.gmra.mxu0 %vm115_vm0, %v831_v15  ;;  %v2496_v24 = vpop.permute.xlu0 %1604  ;;  %v1019_v37 = vmul.f32 %v1017_v42, %v1015_v14  ;;  %v1892_v12 = vld [vmem:[%s2649_s8 + $0x5] sm:$0x1] }
 0x312   :  { %1866 = vmatmul.msk.f32.vlgmr.msrb.gmra.mxu1 %vm115_vm0, %v831_v15  ;;  %988 = vmatpush.msra.mxu0 %v1871_v16 }
 0x313   :  { %1008 = vmatpush.msra.mxu1 %v1872_v17  ;;  %1328 = vperm.xlu0 %1938, %v1892_v12  }
 0x319   :  { %1873 = vmatmul.msk.f32.vlgmr.msra.gmra.mxu0 %vm115_vm0, %v2315_v54  ;;  %v2498_v29 = vpop.permute.xlu0 %1692 }
 0x31a   :  { %1874 = vmatmul.msk.f32.vlgmr.msra.gmra.mxu1 %vm115_vm0, %v2315_v54 }
 0x321   :  { %v687_v44 = vpop.permute.xlu0 %686 }
 0x322   :  { %v689_v25 = vperm.slane %v687_v44, 0 }
 0x382   :  { %v710_v26 = vpop.f32.mrf.mxu0 }
 0x383   :  { %v730_v61 = vpop.f32.mrf.mxu1  ;;  %v711_v30 = vadd.f32 %v710_v26, %v689_v25 }
 0x384   :  { %v731_v33 = vadd.f32 %v730_v61, %v689_v25 }
 0x386   :  { %v735_v34 = vrot.slane %v731_v33, 7 }
 0x388   :  { %v736_v54 = vsel %vm304_vm1, %v711_v30, %v735_v34 }
 0x389   :  { %739 = vst.msk [vmem:[#allocation7 + $0x2] ss:$8 sm:$0x3] %vm2403_vm2, %v736_v54 }
 0x38e   :  { %v859_v35 = vpop.f32.mrf.mxu0 }
 0x38f   :  { %v860_v53 = vadd.f32 %v859_v35, %v2329_v63  ;;  %v879_v36 = vpop.f32.mrf.mxu1 }
 0x390   :  { %v880_v38 = vadd.f32 %v879_v36, %v2329_v63 }
 0x391   :  { %v882_v39 = vsub.f32 0.0, %v860_v53 }
 0x392   :  { %v883_v41 = vsub.f32 0.0, %v880_v38 }
 0x393   :  { %v884_v43 = vmul.f32 1.442695, %v882_v39  ;;  %v1884_v39 = vld [vmem:[%s2643_s2 + $0x58] sm:$0xff] }
 0x394   :  { %v886_v49 = vmul.f32 1.442695, %v883_v41  ;;  %v901_v41 = vpop.permute.xlu1 %900 }
 0x395   :  { %1999 = vpow2.f32 %v884_v43  ;;  %v903_v42 = vperm.slane %v901_v41, 0 }
 0x396   :  { %2001 = vpow2.f32 %v886_v49  ;;  %v990_v51 = vpop.f32.mrf.mxu0 }
 0x397   :  { %v991_v52 = vadd.f32 %v990_v51, %v2321_v59  ;;  %v1010_v63 = vpop.f32.mrf.mxu1 }
 0x398   :  { %v1011_v1 = vadd.f32 %v1010_v63, %v2323_v60 }
 0x399   :  { %v1021_v2 = vadd.f32 %v1019_v37, %v991_v52 }
 0x39a   :  { %v1022_v3 = vadd.f32 %v1020_v32, %v1011_v1 }
 0x39b   :  { %v2000_v62 = vpop.eup %1999  ;;  %v1030_v40 = vadd.f32 %v2331_v0, %v1021_v2 }
 0x39c   :  { %v2002_v7 = vpop.eup %2001  ;;  %v888_v8 = vadd.f32 1.0, %v2000_v62  ;;  %v1031_v9 = vadd.f32 %v2331_v0, %v1022_v3  ;;  %v1867_v0 = vld [vmem:[%s2648_s7 + $0x3] sm:$0x1]  ;;  %v1231_v3 = vperm.slane %v2347_v18, 5 }
 0x39d   :  { %v889_v13 = vadd.f32 1.0, %v2002_v7  ;;  %v1032_v15 = vsub.f32 0.0, %v1030_v40 }
 0x39e   :  { %2003 = vrcp.f32 %v888_v8  ;;  %v1033_v59 = vsub.f32 0.0, %v1031_v9 }
 0x39f   :  { %2005 = vrcp.f32 %v889_v13  ;;  %v1034_v60 = vmul.f32 1.442695, %v1032_v15 }
 0x3a0   :  { %v1036_v16 = vmul.f32 1.442695, %v1033_v59 }
 0x3a1   :  { %2007 = vpow2.f32 %v1034_v60 }
 0x3a2   :  { %2009 = vpow2.f32 %v1036_v16 }
 0x3a4   :  { %v2004_v17 = vpop.eup %2003 }
 0x3a5   :  { %v2006_v14 = vpop.eup %2005  ;;  %v892_v44 = vmul.f32 %v2004_v17, %v860_v53  ;;  %v1045_v53 = vld [vmem:[#allocation5 + $0x20] sm:$0xff] }
 0x3a6   :  { %v893_v25 = vmul.f32 %v2006_v14, %v880_v38  ;;  %v1883_v38 = vld [vmem:[%s2643_s2 + $0x50] sm:$0xff] }
 0x3a7   :  { %v2008_v26 = vpop.eup %2007  ;;  %922 = vmatpush.msrb.mxu2 %v892_v44 }
 0x3a8   :  { %v2010_v61 = vpop.eup %2009  ;;  %v1038_v30 = vadd.f32 1.0, %v2008_v26  ;;  %942 = vmatpush.msrb.mxu3 %v893_v25  ;;  %1869 = vmatmul.msk.f32.vlgmr.msrb.gmra.mxu2 %vm115_vm0, %v1867_v0 }
 0x3a9   :  { %v1039_v33 = vadd.f32 1.0, %v2010_v61  ;;  %1870 = vmatmul.msk.f32.vlgmr.msrb.gmra.mxu3 %vm115_vm0, %v1867_v0 }
 0x3aa   :  { %2011 = vrcp.f32 %v1038_v30 }
 0x3ab   :  { %2013 = vrcp.f32 %v1039_v33 }
 0x3b0   :  { %v2012_v34 = vpop.eup %2011 }
 0x3b1   :  { %v2014_v54 = vpop.eup %2013  ;;  %v1042_v35 = vmul.f32 %v2012_v34, %v1030_v40  ;;  %v1232_v40 = vperm.slane %v2349_v19, 5 }
 0x3b2   :  { %v1043_v36 = vmul.f32 %v2014_v54, %v1031_v9  ;;  %v1233_v9 = vmul.f32 %v1231_v3, %v2446_v56 }
 0x3b3   :  { %1071 = vmatpush.msra.mxu2 %v1042_v35  ;;  %v1234_v12 = vmul.f32 %v1232_v40, %v2446_v56 }
 0x3b4   :  { %1091 = vmatpush.msra.mxu3 %v1043_v36  ;;  %1877 = vmatmul.msk.f32.vlgmr.msra.gmra.mxu2 %vm115_vm0, %v1045_v53 }
 0x3b5   :  { %1878 = vmatmul.msk.f32.vlgmr.msra.gmra.mxu3 %vm115_vm0, %v1045_v53  ;;  %1202 = vmatpush.msrb.mxu2 %v1883_v38 }
 0x3b6   :  { %1222 = vmatpush.msrb.mxu3 %v1884_v39 }
 0x3bc   :  { %1885 = vmatmul.msk.f32.vlgmr.msrb.gmra.mxu2 %vm115_vm0, %v2444_v27 }
 0x3bd   :  { %1886 = vmatmul.msk.f32.vlgmr.msrb.gmra.mxu3 %vm115_vm0, %v2444_v27 }
 0x42b   :  { %v924_v43 = vpop.f32.mrf.mxu2 }
 0x42c   :  { %v944_v48 = vpop.f32.mrf.mxu3  ;;  %v925_v49 = vadd.f32 %v924_v43, %v903_v42  ;;  %v1259_v43 = vld [vmem:[#allocation5 + $0x28] sm:$0xff] }
 0x42d   :  { %v945_v50 = vadd.f32 %v944_v48, %v903_v42 }
 0x42f   :  { %v949_v51 = vrot.slane %v945_v50, 7  ;;  %v1896_v50 = vld [vmem:[%s2643_s2 + $0x68] sm:$0xff] }
 0x431   :  { %v950_v37 = vsel %vm304_vm1, %v925_v49, %v949_v51  ;;  %v1895_v49 = vld [vmem:[%s2643_s2 + $0x60] sm:$0xff] }
 0x432   :  { %953 = vst.msk [vmem:[#allocation7 + $0x3] ss:$8 sm:$0x3] %vm2403_vm2, %v950_v37 }
 0x437   :  { %v1073_v52 = vpop.f32.mrf.mxu2 }
 0x438   :  { %v1074_v63 = vadd.f32 %v1073_v52, %v2490_v20  ;;  %v1093_v32 = vpop.f32.mrf.mxu3 }
 0x439   :  { %v1094_v1 = vadd.f32 %v1093_v32, %v2490_v20 }
 0x43a   :  { %v1096_v2 = vsub.f32 0.0, %v1074_v63 }
 0x43b   :  { %v1097_v27 = vsub.f32 0.0, %v1094_v1 }
 0x43c   :  { %v1098_v62 = vmul.f32 1.442695, %v1096_v2 }
 0x43d   :  { %v1100_v7 = vmul.f32 1.442695, %v1097_v27 }
 0x43e   :  { %2015 = vpow2.f32 %v1098_v62 }
 0x43f   :  { %2017 = vpow2.f32 %v1100_v7  ;;  %v1204_v8 = vpop.f32.mrf.mxu2 }
 0x440   :  { %v1205_v13 = vadd.f32 %v1204_v8, %v2335_v4  ;;  %v1224_v15 = vpop.f32.mrf.mxu3  ;;  %v1880_v4 = vld [vmem:[%s2649_s8 + $0x4] sm:$0x1] }
 0x441   :  { %v1225_v20 = vadd.f32 %v1224_v15, %v2337_v5  ;;  %1114 = vperm.xlu2 %1940, %v1880_v4   ;;  %v1446_v15 = vperm.slane %v2349_v19, 6 }
 0x442   :  { %v1235_v59 = vadd.f32 %v1233_v9, %v1205_v13  ;;  %v1445_v9 = vperm.slane %v2347_v18, 6 }
 0x443   :  { %v1236_v60 = vadd.f32 %v1234_v12, %v1225_v20 }
 0x444   :  { %v2016_v16 = vpop.eup %2015  ;;  %v1244_v17 = vadd.f32 %v2339_v6, %v1235_v59  ;;  %v1447_v59 = vmul.f32 %v1445_v9, %v2450_v57 }
 0x445   :  { %v2018_v14 = vpop.eup %2017  ;;  %v1102_v44 = vadd.f32 1.0, %v2016_v16  ;;  %v1245_v0 = vadd.f32 %v2339_v6, %v1236_v60  ;;  %v1879_v6 = vld [vmem:[%s2648_s7 + $0x4] sm:$0x1] }
 0x446   :  { %v1103_v25 = vadd.f32 1.0, %v2018_v14  ;;  %v1246_v26 = vsub.f32 0.0, %v1244_v17 }
 0x447   :  { %2019 = vrcp.f32 %v1102_v44  ;;  %v1247_v61 = vsub.f32 0.0, %v1245_v0 }
 0x448   :  { %2021 = vrcp.f32 %v1103_v25  ;;  %v1248_v5 = vmul.f32 1.442695, %v1246_v26 }
 0x449   :  { %v1250_v56 = vmul.f32 1.442695, %v1247_v61 }
 0x44a   :  { %2023 = vpow2.f32 %v1248_v5 }
 0x44b   :  { %2025 = vpow2.f32 %v1250_v56 }
 0x44d   :  { %v2020_v30 = vpop.eup %2019 }
 0x44e   :  { %v2022_v33 = vpop.eup %2021  ;;  %v1106_v34 = vmul.f32 %v2020_v30, %v1074_v63 }
 0x44f   :  { %v1107_v54 = vmul.f32 %v2022_v33, %v1094_v1 }
 0x450   :  { %v2024_v35 = vpop.eup %2023  ;;  %1136 = vmatpush.msrb.mxu0 %v1106_v34 }
 0x451   :  { %v2026_v53 = vpop.eup %2025  ;;  %v1252_v36 = vadd.f32 1.0, %v2024_v35  ;;  %1156 = vmatpush.msrb.mxu1 %v1107_v54  ;;  %1881 = vmatmul.msk.f32.vlgmr.msrb.gmra.mxu0 %vm115_vm0, %v1879_v6 }
 0x452   :  { %v1253_v38 = vadd.f32 1.0, %v2026_v53  ;;  %1882 = vmatmul.msk.f32.vlgmr.msrb.gmra.mxu1 %vm115_vm0, %v1879_v6 }
 0x453   :  { %2027 = vrcp.f32 %v1252_v36 }
 0x454   :  { %2029 = vrcp.f32 %v1253_v38 }
 0x459   :  { %v2028_v39 = vpop.eup %2027 }
 0x45a   :  { %v2030_v41 = vpop.eup %2029  ;;  %v1256_v42 = vmul.f32 %v2028_v39, %v1244_v17  ;;  %v1448_v17 = vmul.f32 %v1446_v15, %v2450_v57 }
 0x45b   :  { %v1257_v48 = vmul.f32 %v2030_v41, %v1245_v0 }
 0x45c   :  { %1285 = vmatpush.msra.mxu0 %v1256_v42 }
 0x45d   :  { %1305 = vmatpush.msra.mxu1 %v1257_v48  ;;  %1889 = vmatmul.msk.f32.vlgmr.msra.gmra.mxu0 %vm115_vm0, %v1259_v43 }
 0x45e   :  { %1890 = vmatmul.msk.f32.vlgmr.msra.gmra.mxu1 %vm115_vm0, %v1259_v43  ;;  %1416 = vmatpush.msrb.mxu0 %v1895_v49  ;;  %v1473_v43 = vld [vmem:[#allocation5 + $0x30] sm:$0xff] }
 0x45f   :  { %1436 = vmatpush.msrb.mxu1 %v1896_v50  ;;  %v1907_v49 = vld [vmem:[%s2643_s2 + $0x70] sm:$0xff]  ;;  %v1908_v50 = vld [vmem:[%s2643_s2 + $0x78] sm:$0xff] }
 0x465   :  { %1897 = vmatmul.msk.f32.vlgmr.msrb.gmra.mxu0 %vm115_vm0, %v2448_v47 }
 0x466   :  { %1898 = vmatmul.msk.f32.vlgmr.msrb.gmra.mxu1 %vm115_vm0, %v2448_v47 }
 0x49b   :  { %v1115_v51 = vpop.permute.xlu2 %1114 }
 0x49c   :  { %v1117_v37 = vperm.slane %v1115_v51, 0  ;;  %v1329_v51 = vpop.permute.xlu0 %1328 }
 0x4ce   :  { %v1138_v52 = vpop.f32.mrf.mxu0 }
 0x4cf   :  { %v1158_v63 = vpop.f32.mrf.mxu1  ;;  %v1139_v32 = vadd.f32 %v1138_v52, %v1117_v37 }
 0x4d0   :  { %v1159_v1 = vadd.f32 %v1158_v63, %v1117_v37  ;;  %v1331_v37 = vperm.slane %v1329_v51, 0 }
 0x4d2   :  { %v1163_v2 = vrot.slane %v1159_v1, 7 }
 0x4d4   :  { %v1164_v27 = vsel %vm304_vm1, %v1139_v32, %v1163_v2 }
 0x4d5   :  { %1167 = vst.msk [vmem:[#allocation7 + $0x4] ss:$8 sm:$0x3] %vm2403_vm2, %v1164_v27 }
 0x4da   :  { %v1287_v3 = vpop.f32.mrf.mxu0 }
 0x4db   :  { %v1288_v62 = vadd.f32 %v1287_v3, %v2492_v55  ;;  %v1307_v40 = vpop.f32.mrf.mxu1 }
 0x4dc   :  { %v1308_v7 = vadd.f32 %v1307_v40, %v2492_v55 }
 0x4dd   :  { %v1310_v8 = vsub.f32 0.0, %v1288_v62 }
 0x4de   :  { %v1311_v47 = vsub.f32 0.0, %v1308_v7 }
 0x4df   :  { %v1312_v13 = vmul.f32 1.442695, %v1310_v8 }
 0x4e0   :  { %v1314_v12 = vmul.f32 1.442695, %v1311_v47  ;;  %v1608_v47 = vperm.slane %v2303_v46, 7 }
 0x4e1   :  { %2031 = vpow2.f32 %v1312_v13  ;;  %v1659_v13 = vperm.slane %v2347_v18, 7 }
 0x4e2   :  { %2033 = vpow2.f32 %v1314_v12  ;;  %v1418_v20 = vpop.f32.mrf.mxu0  ;;  %v1660_v12 = vperm.slane %v2349_v19, 7 }
 0x4e3   :  { %v1419_v60 = vadd.f32 %v1418_v20, %v2343_v10  ;;  %v1438_v16 = vpop.f32.mrf.mxu1  ;;  %v1916_v10 = vld [vmem:[%s2649_s8 + $0x7] sm:$0x1]  ;;  %v1661_v46 = vmul.f32 %v1659_v13, %v2401_v22 }
 0x4e4   :  { %v1439_v55 = vadd.f32 %v1438_v16, %v2345_v11  ;;  %1756 = vperm.xlu2 %1940, %v1916_v10   ;;  %v1915_v13 = vld [vmem:[%s2648_s7 + $0x7] sm:$0x1] }
 0x4e5   :  { %v1449_v14 = vadd.f32 %v1447_v59, %v1419_v60  ;;  %v1904_v60 = vld [vmem:[%s2649_s8 + $0x6] sm:$0x1] }
 0x4e6   :  { %v1450_v44 = vadd.f32 %v1448_v17, %v1439_v55  ;;  %1542 = vperm.xlu1 %1942, %v1904_v60   ;;  %v1662_v17 = vmul.f32 %v1660_v12, %v2401_v22 }
 0x4e7   :  { %v2032_v0 = vpop.eup %2031  ;;  %v1458_v25 = vadd.f32 %v2494_v23, %v1449_v14 }
 0x4e8   :  { %v2034_v26 = vpop.eup %2033  ;;  %v1316_v4 = vadd.f32 1.0, %v2032_v0  ;;  %v1459_v61 = vadd.f32 %v2494_v23, %v1450_v44  ;;  %v1891_v23 = vld [vmem:[%s2648_s7 + $0x5] sm:$0x1] }
 0x4e9   :  { %v1317_v5 = vadd.f32 1.0, %v2034_v26  ;;  %v1460_v56 = vsub.f32 0.0, %v1458_v25 }
 0x4ea   :  { %2035 = vrcp.f32 %v1316_v4  ;;  %v1461_v30 = vsub.f32 0.0, %v1459_v61 }
 0x4eb   :  { %2037 = vrcp.f32 %v1317_v5  ;;  %v1462_v11 = vmul.f32 1.442695, %v1460_v56 }
 0x4ec   :  { %v1464_v57 = vmul.f32 1.442695, %v1461_v30 }
 0x4ed   :  { %2039 = vpow2.f32 %v1462_v11 }
 0x4ee   :  { %2041 = vpow2.f32 %v1464_v57  ;;  %v1903_v57 = vld [vmem:[%s2648_s7 + $0x6] sm:$0x1] }
 0x4f0   :  { %v2036_v33 = vpop.eup %2035 }
 0x4f1   :  { %v2038_v34 = vpop.eup %2037  ;;  %v1320_v6 = vmul.f32 %v2036_v33, %v1288_v62 }
 0x4f2   :  { %v1321_v54 = vmul.f32 %v2038_v34, %v1308_v7 }
 0x4f3   :  { %v2040_v35 = vpop.eup %2039  ;;  %1350 = vmatpush.msra.mxu2 %v1320_v6 }
 0x4f4   :  { %v2042_v53 = vpop.eup %2041  ;;  %v1466_v36 = vadd.f32 1.0, %v2040_v35  ;;  %1370 = vmatpush.msra.mxu3 %v1321_v54  ;;  %1893 = vmatmul.msk.f32.vlgmr.msra.gmra.mxu2 %vm115_vm0, %v1891_v23 }
 0x4f5   :  { %v1467_v38 = vadd.f32 1.0, %v2042_v53  ;;  %1894 = vmatmul.msk.f32.vlgmr.msra.gmra.mxu3 %vm115_vm0, %v1891_v23 }
 0x4f6   :  { %2043 = vrcp.f32 %v1466_v36  ;;  %v1687_v36 = vld [vmem:[#allocation5 + $0x38] sm:$0xff] }
 0x4f7   :  { %2045 = vrcp.f32 %v1467_v38 }
 0x4fc   :  { %v2044_v39 = vpop.eup %2043 }
 0x4fd   :  { %v2046_v41 = vpop.eup %2045  ;;  %v1470_v42 = vmul.f32 %v2044_v39, %v1458_v25 }
 0x4fe   :  { %v1471_v48 = vmul.f32 %v2046_v41, %v1459_v61 }
 0x4ff   :  { %1499 = vmatpush.msrb.mxu2 %v1470_v42 }
 0x500   :  { %1519 = vmatpush.msrb.mxu3 %v1471_v48  ;;  %1901 = vmatmul.msk.f32.vlgmr.msrb.gmra.mxu2 %vm115_vm0, %v1473_v43 }
 0x501   :  { %1902 = vmatmul.msk.f32.vlgmr.msrb.gmra.mxu3 %vm115_vm0, %v1473_v43  ;;  %1630 = vmatpush.msra.mxu2 %v1907_v49 }
 0x502   :  { %1650 = vmatpush.msra.mxu3 %v1908_v50 }
 0x508   :  { %1909 = vmatmul.msk.f32.vlgmr.msra.gmra.mxu2 %vm115_vm0, %v2399_v21 }
 0x509   :  { %1910 = vmatmul.msk.f32.vlgmr.msra.gmra.mxu3 %vm115_vm0, %v2399_v21  ;;  %v1607_v21 = vperm.slane %v2301_v45, 7 }
 0x50b   :  { %v1609_v59 = vmul.f32 %v1607_v21, %v2496_v24 }
 0x558   :  { %v1543_v39 = vpop.permute.xlu1 %1542 }
 0x559   :  { %v1545_v41 = vperm.slane %v1543_v39, 0 }
 0x577   :  { %v1352_v52 = vpop.f32.mrf.mxu2 }
 0x578   :  { %v1372_v63 = vpop.f32.mrf.mxu3  ;;  %v1353_v1 = vadd.f32 %v1352_v52, %v1331_v37 }
 0x579   :  { %v1373_v32 = vadd.f32 %v1372_v63, %v1331_v37 }
 0x57b   :  { %v1377_v2 = vrot.slane %v1373_v32, 7 }
 0x57d   :  { %v1378_v27 = vsel %vm304_vm1, %v1353_v1, %v1377_v2 }
 0x57e   :  { %1381 = vst.msk [vmem:[#allocation7 + $0x5] ss:$8 sm:$0x3] %vm2403_vm2, %v1378_v27 }
 0x583   :  { %v1501_v3 = vpop.f32.mrf.mxu2 }
 0x584   :  { %v1502_v62 = vadd.f32 %v1501_v3, %v2452_v58  ;;  %v1521_v40 = vpop.f32.mrf.mxu3 }
 0x585   :  { %v1522_v7 = vadd.f32 %v1521_v40, %v2452_v58  ;;  %v1610_v58 = vmul.f32 %v1608_v47, %v2496_v24 }
 0x586   :  { %v1524_v8 = vsub.f32 0.0, %v1502_v62 }
 0x587   :  { %v1525_v9 = vsub.f32 0.0, %v1522_v7 }
 0x588   :  { %v1526_v15 = vmul.f32 1.442695, %v1524_v8 }
 0x589   :  { %v1528_v20 = vmul.f32 1.442695, %v1525_v9 }
 0x58a   :  { %2047 = vpow2.f32 %v1526_v15  ;;  %v1757_v15 = vpop.permute.xlu2 %1756 }
 0x58b   :  { %2049 = vpow2.f32 %v1528_v20  ;;  %v1632_v45 = vpop.f32.mrf.mxu2  ;;  %v1759_v12 = vperm.slane %v1757_v15, 0 }
 0x58c   :  { %v1633_v16 = vadd.f32 %v1632_v45, %v1609_v59  ;;  %v1652_v18 = vpop.f32.mrf.mxu3 }
 0x58d   :  { %v1653_v19 = vadd.f32 %v1652_v18, %v1610_v58 }
 0x58e   :  { %v1663_v55 = vadd.f32 %v1661_v46, %v1633_v16 }
 0x58f   :  { %v1664_v14 = vadd.f32 %v1662_v17, %v1653_v19 }
 0x590   :  { %v2048_v44 = vpop.eup %2047  ;;  %v1672_v0 = vadd.f32 %v2454_v28, %v1663_v55 }
 0x591   :  { %v2050_v25 = vpop.eup %2049  ;;  %v1530_v26 = vadd.f32 1.0, %v2048_v44  ;;  %v1673_v4 = vadd.f32 %v2454_v28, %v1664_v14 }
 0x592   :  { %v1531_v24 = vadd.f32 1.0, %v2050_v25  ;;  %v1674_v61 = vsub.f32 0.0, %v1672_v0 }
 0x593   :  { %2051 = vrcp.f32 %v1530_v26  ;;  %v1675_v5 = vsub.f32 0.0, %v1673_v4 }
 0x594   :  { %2053 = vrcp.f32 %v1531_v24  ;;  %v1676_v56 = vmul.f32 1.442695, %v1674_v61 }
 0x595   :  { %v1678_v10 = vmul.f32 1.442695, %v1675_v5 }
 0x596   :  { %2055 = vpow2.f32 %v1676_v56 }
 0x597   :  { %2057 = vpow2.f32 %v1678_v10 }
 0x599   :  { %v2052_v22 = vpop.eup %2051 }
 0x59a   :  { %v2054_v30 = vpop.eup %2053  ;;  %v1534_v11 = vmul.f32 %v2052_v22, %v1502_v62 }
 0x59b   :  { %v1535_v33 = vmul.f32 %v2054_v30, %v1522_v7 }
 0x59c   :  { %v2056_v34 = vpop.eup %2055  ;;  %1564 = vmatpush.msra.mxu0 %v1534_v11 }
 0x59d   :  { %v2058_v28 = vpop.eup %2057  ;;  %v1680_v6 = vadd.f32 1.0, %v2056_v34  ;;  %1584 = vmatpush.msra.mxu1 %v1535_v33  ;;  %1905 = vmatmul.msk.f32.vlgmr.msra.gmra.mxu0 %vm115_vm0, %v1903_v57 }
 0x59e   :  { %v1681_v23 = vadd.f32 1.0, %v2058_v28  ;;  %1906 = vmatmul.msk.f32.vlgmr.msra.gmra.mxu1 %vm115_vm0, %v1903_v57 }
 0x59f   :  { %2059 = vrcp.f32 %v1680_v6 }
 0x5a0   :  { %2061 = vrcp.f32 %v1681_v23 }
 0x5a5   :  { %v2060_v54 = vpop.eup %2059 }
 0x5a6   :  { %v2062_v35 = vpop.eup %2061  ;;  %v1684_v53 = vmul.f32 %v2060_v54, %v1672_v0 }
 0x5a7   :  { %v1685_v38 = vmul.f32 %v2062_v35, %v1673_v4 }
 0x5a8   :  { %1713 = vmatpush.msrb.mxu0 %v1684_v53 }
 0x5a9   :  { %1733 = vmatpush.msrb.mxu1 %v1685_v38  ;;  %1913 = vmatmul.msk.f32.vlgmr.msrb.gmra.mxu0 %vm115_vm0, %v1687_v36 }
 0x5aa   :  { %1914 = vmatmul.msk.f32.vlgmr.msrb.gmra.mxu1 %vm115_vm0, %v1687_v36 }
 0x61a   :  { %v1566_v42 = vpop.f32.mrf.mxu0 }
 0x61b   :  { %v1586_v43 = vpop.f32.mrf.mxu1  ;;  %v1567_v48 = vadd.f32 %v1566_v42, %v1545_v41 }
 0x61c   :  { %v1587_v49 = vadd.f32 %v1586_v43, %v1545_v41 }
 0x61e   :  { %v1591_v50 = vrot.slane %v1587_v49, 7 }
 0x620   :  { %v1592_v51 = vsel %vm304_vm1, %v1567_v48, %v1591_v50 }
 0x621   :  { %1595 = vst.msk [vmem:[#allocation7 + $0x6] ss:$8 sm:$0x3] %vm2403_vm2, %v1592_v51 }
 0x626   :  { %v1715_v37 = vpop.f32.mrf.mxu0 }
 0x627   :  { %v1716_v52 = vadd.f32 %v1715_v37, %v2498_v29  ;;  %v1735_v63 = vpop.f32.mrf.mxu1 }
 0x628   :  { %v1736_v32 = vadd.f32 %v1735_v63, %v2498_v29 }
 0x629   :  { %v1738_v1 = vsub.f32 0.0, %v1716_v52 }
 0x62a   :  { %v1739_v2 = vsub.f32 0.0, %v1736_v32 }
 0x62b   :  { %v1740_v27 = vmul.f32 1.442695, %v1738_v1 }
 0x62c   :  { %v1742_v3 = vmul.f32 1.442695, %v1739_v2 }
 0x62d   :  { %2063 = vpow2.f32 %v1740_v27 }
 0x62e   :  { %2065 = vpow2.f32 %v1742_v3 }
 0x633   :  { %v2064_v62 = vpop.eup %2063 }
 0x634   :  { %v2066_v40 = vpop.eup %2065  ;;  %v1744_v7 = vadd.f32 1.0, %v2064_v62 }
 0x635   :  { %v1745_v21 = vadd.f32 1.0, %v2066_v40 }
 0x636   :  { %2067 = vrcp.f32 %v1744_v7 }
 0x637   :  { %2069 = vrcp.f32 %v1745_v21 }
 0x63c   :  { %v2068_v8 = vpop.eup %2067 }
 0x63d   :  { %v2070_v47 = vpop.eup %2069  ;;  %v1748_v9 = vmul.f32 %v2068_v8, %v1716_v52 }
 0x63e   :  { %v1749_v29 = vmul.f32 %v2070_v47, %v1736_v32 }
 0x63f   :  { %1778 = vmatpush.msrb.mxu2 %v1748_v9 }
 0x640   :  { %1798 = vmatpush.msrb.mxu3 %v1749_v29  ;;  %1917 = vmatmul.msk.f32.vlgmr.msrb.gmra.mxu2 %vm115_vm0, %v1915_v13 }
 0x641   :  { %1918 = vmatmul.msk.f32.vlgmr.msrb.gmra.mxu3 %vm115_vm0, %v1915_v13 }
 0x6c3   :  { %v1780_v20 = vpop.f32.mrf.mxu2 }
 0x6c4   :  { %v1800_v59 = vpop.f32.mrf.mxu3  ;;  %v1781_v58 = vadd.f32 %v1780_v20, %v1759_v12 }
 0x6c5   :  { %v1801_v60 = vadd.f32 %v1800_v59, %v1759_v12 }
 0x6c7   :  { %v1805_v45 = vrot.slane %v1801_v60, 7 }
 0x6c9   :  { %v1806_v46 = vsel %vm304_vm1, %v1781_v58, %v1805_v45 }
 0x6ca   :  { %1809 = vst.msk [vmem:[#allocation7 + $0x7] ss:$8 sm:$0x3] %vm2403_vm2, %v1806_v46 }
 0x6cb   :  { %1821 = dma.vmem_to_hbm [thread:$0]  %s1817_s18, 256, %s1819_s3, [#allocation4]  }
 0x6cc   :  { %2147 = dma.done.wait [#allocation4], 256  }
 0x6cd   :  { %2148 = vsyncadd [#allocation4], 4294967040 }
 0x6ce   :  { %1826 = vsyncpa [#allocation3], 1 }
 0x6cf   :  { %1827 = vsyncpa [#allocation6], 1 }
 0x6d0   :  { %1828 = vsyncpa [#allocation4], 1 }

</bundles_post_ra>
